<compile_context>
chip_gen: v5e
topology: v5e:2x2
jax: 0.10.0
libtpu: 0.0.40
codegen_flags: <defaults>
</compile_context>

<pallas_src>
import math
import functools

import jax
import jax.numpy as jnp
from jax import lax
from jax.experimental import pallas as pl


# ------------------------------ fused kernel --------------------------------

def _mha_body(q_ref, k_ref, v_ref, w_ref, b_ref, out_ref, attnw_ref, *, num_heads):
    """Single-step body: whole batch + all heads handled with static loops."""
    L, N, E = q_ref.shape
    S = k_ref.shape[0]
    H = num_heads
    Dh = E // H

    # Packed params: w_ref (4,E,E) = [Wq^T*scale, Wk^T, Wv^T, Wo^T]; b_ref (4,1,E).
    wq = w_ref[0]
    wk = w_ref[1]
    wv = w_ref[2]
    wo = w_ref[3]
    bq = b_ref[0]
    bk = b_ref[1]
    bv = b_ref[2]
    bo = b_ref[3]

    q_all = q_ref[...].astype(jnp.float32)   # (L, N, E)
    k_all = k_ref[...].astype(jnp.float32)   # (S, N, E)
    v_all = v_ref[...].astype(jnp.float32)   # (S, N, E)

    # Contract last dim of both operands -> q @ k^T without materializing k^T.
    dn_qk = (((1,), (1,)), ((), ()))

    outs = []
    attnws = []
    for n in range(N):                       # static unroll: tiny batch
        qp = jnp.dot(q_all[:, n, :], wq, preferred_element_type=jnp.float32) + bq
        kp = jnp.dot(k_all[:, n, :], wk, preferred_element_type=jnp.float32) + bk
        vp = jnp.dot(v_all[:, n, :], wv, preferred_element_type=jnp.float32) + bv

        out_n = jnp.zeros((L, E), jnp.float32)
        w_sum = jnp.zeros((L, S), jnp.float32) if attnw_ref is not None else None
        for h in range(H):                   # static unroll: tiny head count
            lo = h * Dh
            qh = qp[:, lo:lo + Dh]           # (L, Dh) — head scale already folded in
            kh = kp[:, lo:lo + Dh]           # (S, Dh)
            vh = vp[:, lo:lo + Dh]           # (S, Dh)

            logits = lax.dot_general(qh, kh, dn_qk,
                                     preferred_element_type=jnp.float32)   # (L, S)
            m = jnp.max(logits, axis=-1, keepdims=True)
            p = jnp.exp(logits - m)
            denom = jnp.sum(p, axis=-1, keepdims=True)
            p = p * pl.reciprocal(denom, approx=False)    # exact: rows sum to 1

            ctx_h = jnp.dot(p, vh, preferred_element_type=jnp.float32)     # (L, Dh)
            # Per-head output-projection accumulation (no lane-dim concat).
            out_n = out_n + jnp.dot(ctx_h, wo[lo:lo + Dh, :],
                                    preferred_element_type=jnp.float32)
            if attnw_ref is not None:
                w_sum = w_sum + p

        outs.append(out_n + bo)                           # (L, E)
        if attnw_ref is not None:
            attnws.append(w_sum * (1.0 / H))              # (L, S)

    # Single full-block stores.
    out_ref[...] = jnp.stack(outs, axis=1).astype(out_ref.dtype)            # (L, N, E)
    if attnw_ref is not None:
        attnw_ref[...] = jnp.stack(attnws, axis=0).astype(attnw_ref.dtype)  # (N, L, S)


def _fused_mha_kernel(q_ref, k_ref, v_ref, w_ref, b_ref, out_ref, attnw_ref,
                      *, num_heads):
    _mha_body(q_ref, k_ref, v_ref, w_ref, b_ref, out_ref, attnw_ref,
              num_heads=num_heads)


def _fused_mha_kernel_noweights(q_ref, k_ref, v_ref, w_ref, b_ref, out_ref,
                                *, num_heads):
    _mha_body(q_ref, k_ref, v_ref, w_ref, b_ref, out_ref, None,
              num_heads=num_heads)


# ------------------------------ module wrapper -------------------------------

def multihead_attention(query, key, value, w_packed, b_packed,
                        *, num_heads, need_weights=True):
    """query (L,N,E); key/value (S,N,E).
    w_packed (4,E,E) = [Wq^T*scale, Wk^T, Wv^T, Wo^T]; b_packed (4,1,E)."""
    L, N, E = query.shape
    S = key.shape[0]
    assert E % num_heads == 0

    if need_weights:
        out, attn_w = pl.pallas_call(
            functools.partial(_fused_mha_kernel, num_heads=num_heads),
            out_shape=(
                jax.ShapeDtypeStruct((L, N, E), query.dtype),
                jax.ShapeDtypeStruct((N, L, S), jnp.float32),
            ),
        )(query, key, value, w_packed, b_packed)
        return out, attn_w

    out = pl.pallas_call(
        functools.partial(_fused_mha_kernel_noweights, num_heads=num_heads),
        out_shape=jax.ShapeDtypeStruct((L, N, E), query.dtype),
    )(query, key, value, w_packed, b_packed)
    return out, None


class MultiClassAttention:
    """Independent multihead attention per class (Pallas-backed forward)."""

    def __init__(self, embed_dim, num_heads, num_classes, dropout=0.1, seed=0):
        self.embed_dim = embed_dim
        self.num_heads = num_heads
        self.num_classes = num_classes
        E = embed_dim
        assert E % num_heads == 0
        scale = 1.0 / math.sqrt(E // num_heads)

        key = jax.random.PRNGKey(seed)
        ks = jax.random.split(key, 2 * num_classes)
        s_in = 1.0 / math.sqrt(E)
        # PyTorch-layout params (packed (3E,E) in_proj, (E,E) out_proj, zero biases),
        # converted ONCE at init to the kernel layout: transposed to (in,out), head
        # scale folded into Wq/bq, and packed into a single (4,E,E)/(4,1,E) stack per
        # class — no per-call transposes and only 2 constant refs per kernel launch.
        # TODO(synk): init differs from nn.MultiheadAttention (xavier_uniform_); the
        # kernel math is init-agnostic.
        in_proj_w = jnp.stack([
            jax.random.uniform(ks[2 * c], (3 * E, E),
                               minval=-s_in, maxval=s_in, dtype=jnp.float32)
            for c in range(num_classes)
        ])                                                   # (C, 3E, E)
        in_proj_b = jnp.zeros((num_classes, 3 * E), jnp.float32)
        out_w = jnp.stack([
            jax.random.uniform(ks[2 * c + 1], (E, E),
                               minval=-s_in, maxval=s_in, dtype=jnp.float32)
            for c in range(num_classes)
        ])                                                   # (C, E, E)
        out_b = jnp.zeros((num_classes, E), jnp.float32)

        wq_t = jnp.swapaxes(in_proj_w[:, 0 * E:1 * E, :], 1, 2) * scale   # (C, E, E)
        wk_t = jnp.swapaxes(in_proj_w[:, 1 * E:2 * E, :], 1, 2)
        wv_t = jnp.swapaxes(in_proj_w[:, 2 * E:3 * E, :], 1, 2)
        wo_t = jnp.swapaxes(out_w, 1, 2)
        self.w_packed = jnp.stack([wq_t, wk_t, wv_t, wo_t], axis=1)       # (C, 4, E, E)

        bq = in_proj_b[:, 0 * E:1 * E] * scale
        bk = in_proj_b[:, 1 * E:2 * E]
        bv = in_proj_b[:, 2 * E:3 * E]
        self.b_packed = jnp.stack([bq, bk, bv, out_b], axis=1)[:, :, None, :]  # (C,4,1,E)

        self._forward = jax.jit(
            functools.partial(multihead_attention, num_heads=num_heads))

    def forward(self, query, key, value, class_idx):
        c = class_idx
        return self._forward(query, key, value, self.w_packed[c], self.b_packed[c])

    __call__ = forward


# ------------------------------ pure-JAX reference ---------------------------

def _reference_mha(query, key, value, w_packed, b_packed, num_heads):
    L, N, E = query.shape
    S = key.shape[0]
    Dh = E // num_heads
    wq, wk, wv, wo = (w_packed[i] for i in range(4))
    bq, bk, bv, bo = (b_packed[i, 0] for i in range(4))
    qp = query @ wq + bq          # head scale already folded into wq/bq
    kp = key @ wk + bk
    vp = value @ wv + bv
    qh = qp.reshape(L, N, num_heads, Dh).transpose(1, 2, 0, 3)   # (N,H,L,Dh)
    kh = kp.reshape(S, N, num_heads, Dh).transpose(1, 2, 0, 3)
    vh = vp.reshape(S, N, num_heads, Dh).transpose(1, 2, 0, 3)
    logits = jnp.einsum('nhld,nhsd->nhls', qh, kh)
    p = jax.nn.softmax(logits, axis=-1)
    ctx = jnp.einsum('nhls,nhsd->nhld', p, vh)
    ctx = ctx.transpose(2, 0, 1, 3).reshape(L, N, E)
    out = ctx @ wo + bo
    return out, jnp.mean(p, axis=1)


# ---------------------------------- demo -------------------------------------

if __name__ == "__main__":
    embed_dim, num_heads, num_classes = 32, 4, 3
    L, S, N = 8, 8, 2   # query len, key len, batch

    module = MultiClassAttention(embed_dim, num_heads, num_classes)

    key = jax.random.PRNGKey(0)
    kq, kk, kv = jax.random.split(key, 3)
    query = jax.random.normal(kq, (L, N, embed_dim), dtype=jnp.float32)
    k_in = jax.random.normal(kk, (S, N, embed_dim), dtype=jnp.float32)
    v_in = jax.random.normal(kv, (S, N, embed_dim), dtype=jnp.float32)

    out, attn_w = module(query, k_in, v_in, class_idx=1)
    jax.block_until_ready((out, attn_w))

    assert out.shape == (L, N, embed_dim)
    assert attn_w.shape == (N, L, S)

    # Correctness check against a pure-JAX reference.
    c = 1
    ref_out, ref_w = _reference_mha(query, k_in, v_in,
                                    module.w_packed[c], module.b_packed[c], num_heads)
    assert bool(jnp.allclose(out, ref_out, rtol=1e-3, atol=1e-3)), "output mismatch"
    assert bool(jnp.allclose(attn_w, ref_w, rtol=1e-3, atol=1e-3)), "weights mismatch"
    # Exact softmax normalization: attention rows sum to 1.
    assert bool(jnp.allclose(jnp.sum(attn_w, axis=-1), 1.0, atol=1e-5)), "rows != 1"

    print("KERNEL_OK")
</pallas_src>

<mosaic_0001>
module attributes {stable_mosaic.version = 11 : i64} {
  func.func @_fused_mha_kernel(%arg0: memref<8x2x32xf32, #tpu.memory_space<vmem>>, %arg1: memref<8x2x32xf32, #tpu.memory_space<vmem>>, %arg2: memref<8x2x32xf32, #tpu.memory_space<vmem>>, %arg3: memref<4x32x32xf32, #tpu.memory_space<vmem>>, %arg4: memref<4x1x32xf32, #tpu.memory_space<vmem>>, %arg5: memref<8x2x32xf32, #tpu.memory_space<vmem>>, %arg6: memref<2x8x8xf32, #tpu.memory_space<vmem>>) attributes {dimension_semantics = [], scalar_prefetch = 0 : i64, scratch_operands = 0 : i64, tpu.core_type = #tpu.core_type<tc>} {
    %c0 = arith.constant 0 : index
    %c0_0 = arith.constant 0 : index
    %c0_1 = arith.constant 0 : index
    %0 = vector.load %arg3[%c0, %c0_0, %c0_1] : memref<4x32x32xf32, #tpu.memory_space<vmem>>, vector<1x32x32xf32>
    %1 = vector.shape_cast %0 : vector<1x32x32xf32> to vector<32x32xf32>
    %c1 = arith.constant 1 : index
    %c0_2 = arith.constant 0 : index
    %c0_3 = arith.constant 0 : index
    %2 = vector.load %arg3[%c1, %c0_2, %c0_3] : memref<4x32x32xf32, #tpu.memory_space<vmem>>, vector<1x32x32xf32>
    %3 = vector.shape_cast %2 : vector<1x32x32xf32> to vector<32x32xf32>
    %c2 = arith.constant 2 : index
    %c0_4 = arith.constant 0 : index
    %c0_5 = arith.constant 0 : index
    %4 = vector.load %arg3[%c2, %c0_4, %c0_5] : memref<4x32x32xf32, #tpu.memory_space<vmem>>, vector<1x32x32xf32>
    %5 = vector.shape_cast %4 : vector<1x32x32xf32> to vector<32x32xf32>
    %c3 = arith.constant 3 : index
    %c0_6 = arith.constant 0 : index
    %c0_7 = arith.constant 0 : index
    %6 = vector.load %arg3[%c3, %c0_6, %c0_7] : memref<4x32x32xf32, #tpu.memory_space<vmem>>, vector<1x32x32xf32>
    %7 = vector.shape_cast %6 : vector<1x32x32xf32> to vector<32x32xf32>
    %c0_8 = arith.constant 0 : index
    %c0_9 = arith.constant 0 : index
    %c0_10 = arith.constant 0 : index
    %8 = vector.load %arg4[%c0_8, %c0_9, %c0_10] : memref<4x1x32xf32, #tpu.memory_space<vmem>>, vector<1x1x32xf32>
    %9 = vector.shape_cast %8 : vector<1x1x32xf32> to vector<1x32xf32>
    %c1_11 = arith.constant 1 : index
    %c0_12 = arith.constant 0 : index
    %c0_13 = arith.constant 0 : index
    %10 = vector.load %arg4[%c1_11, %c0_12, %c0_13] : memref<4x1x32xf32, #tpu.memory_space<vmem>>, vector<1x1x32xf32>
    %11 = vector.shape_cast %10 : vector<1x1x32xf32> to vector<1x32xf32>
    %c2_14 = arith.constant 2 : index
    %c0_15 = arith.constant 0 : index
    %c0_16 = arith.constant 0 : index
    %12 = vector.load %arg4[%c2_14, %c0_15, %c0_16] : memref<4x1x32xf32, #tpu.memory_space<vmem>>, vector<1x1x32xf32>
    %13 = vector.shape_cast %12 : vector<1x1x32xf32> to vector<1x32xf32>
    %c3_17 = arith.constant 3 : index
    %c0_18 = arith.constant 0 : index
    %c0_19 = arith.constant 0 : index
    %14 = vector.load %arg4[%c3_17, %c0_18, %c0_19] : memref<4x1x32xf32, #tpu.memory_space<vmem>>, vector<1x1x32xf32>
    %15 = vector.shape_cast %14 : vector<1x1x32xf32> to vector<1x32xf32>
    %c0_20 = arith.constant 0 : index
    %c0_21 = arith.constant 0 : index
    %c0_22 = arith.constant 0 : index
    %16 = vector.load %arg0[%c0_20, %c0_21, %c0_22] : memref<8x2x32xf32, #tpu.memory_space<vmem>>, vector<8x2x32xf32>
    %c0_23 = arith.constant 0 : index
    %c0_24 = arith.constant 0 : index
    %c0_25 = arith.constant 0 : index
    %17 = vector.load %arg1[%c0_23, %c0_24, %c0_25] : memref<8x2x32xf32, #tpu.memory_space<vmem>>, vector<8x2x32xf32>
    %c0_26 = arith.constant 0 : index
    %c0_27 = arith.constant 0 : index
    %c0_28 = arith.constant 0 : index
    %18 = vector.load %arg2[%c0_26, %c0_27, %c0_28] : memref<8x2x32xf32, #tpu.memory_space<vmem>>, vector<8x2x32xf32>
    %19 = vector.extract_strided_slice %16 {offsets = [0, 0, 0], sizes = [8, 1, 32], strides = [1, 1, 1]} : vector<8x2x32xf32> to vector<8x1x32xf32>
    %20 = vector.shape_cast %19 : vector<8x1x32xf32> to vector<8x32xf32>
    %cst = arith.constant dense<0.000000e+00> : vector<8x32xf32>
    %21 = tpu.matmul %20, %1, %cst {dimension_numbers = #tpu.dot_dimension_numbers<[1], [0], [0], [1], [0, 0, 1, 1], [], []>} : vector<8x32xf32>, vector<32x32xf32>, vector<8x32xf32> -> vector<8x32xf32>
    %22 = vector.broadcast %9 : vector<1x32xf32> to vector<8x32xf32>
    %23 = arith.addf %21, %22 : vector<8x32xf32>
    %24 = vector.extract_strided_slice %17 {offsets = [0, 0, 0], sizes = [8, 1, 32], strides = [1, 1, 1]} : vector<8x2x32xf32> to vector<8x1x32xf32>
    %25 = vector.shape_cast %24 : vector<8x1x32xf32> to vector<8x32xf32>
    %cst_29 = arith.constant dense<0.000000e+00> : vector<8x32xf32>
    %26 = tpu.matmul %25, %3, %cst_29 {dimension_numbers = #tpu.dot_dimension_numbers<[1], [0], [0], [1], [0, 0, 1, 1], [], []>} : vector<8x32xf32>, vector<32x32xf32>, vector<8x32xf32> -> vector<8x32xf32>
    %27 = vector.broadcast %11 : vector<1x32xf32> to vector<8x32xf32>
    %28 = arith.addf %26, %27 : vector<8x32xf32>
    %29 = vector.extract_strided_slice %18 {offsets = [0, 0, 0], sizes = [8, 1, 32], strides = [1, 1, 1]} : vector<8x2x32xf32> to vector<8x1x32xf32>
    %30 = vector.shape_cast %29 : vector<8x1x32xf32> to vector<8x32xf32>
    %cst_30 = arith.constant dense<0.000000e+00> : vector<8x32xf32>
    %31 = tpu.matmul %30, %5, %cst_30 {dimension_numbers = #tpu.dot_dimension_numbers<[1], [0], [0], [1], [0, 0, 1, 1], [], []>} : vector<8x32xf32>, vector<32x32xf32>, vector<8x32xf32> -> vector<8x32xf32>
    %32 = vector.broadcast %13 : vector<1x32xf32> to vector<8x32xf32>
    %33 = arith.addf %31, %32 : vector<8x32xf32>
    %cst_31 = arith.constant 0.000000e+00 : f32
    %34 = vector.broadcast %cst_31 : f32 to vector<8x32xf32>
    %cst_32 = arith.constant 0.000000e+00 : f32
    %35 = vector.broadcast %cst_32 : f32 to vector<8x8xf32>
    %36 = vector.extract_strided_slice %23 {offsets = [0, 0], sizes = [8, 8], strides = [1, 1]} : vector<8x32xf32> to vector<8x8xf32>
    %37 = vector.extract_strided_slice %28 {offsets = [0, 0], sizes = [8, 8], strides = [1, 1]} : vector<8x32xf32> to vector<8x8xf32>
    %38 = vector.extract_strided_slice %33 {offsets = [0, 0], sizes = [8, 8], strides = [1, 1]} : vector<8x32xf32> to vector<8x8xf32>
    %cst_33 = arith.constant dense<0.000000e+00> : vector<8x8xf32>
    %39 = tpu.matmul %36, %37, %cst_33 {dimension_numbers = #tpu.dot_dimension_numbers<[1], [1], [0], [0], [0, 0, 1, 0], [], []>} : vector<8x8xf32>, vector<8x8xf32>, vector<8x8xf32> -> vector<8x8xf32>
    %cst_34 = arith.constant dense<0xFF800000> : vector<8xf32>
    %40 = vector.multi_reduction <maximumf>, %39, %cst_34 [1] : vector<8x8xf32> to vector<8xf32>
    %41 = vector.shape_cast %40 : vector<8xf32> to vector<8x1xf32>
    %42 = vector.broadcast %41 : vector<8x1xf32> to vector<8x8xf32>
    %43 = arith.subf %39, %42 : vector<8x8xf32>
    %44 = math.exp %43 : vector<8x8xf32>
    %cst_35 = arith.constant dense<0.000000e+00> : vector<8xf32>
    %45 = vector.multi_reduction <add>, %44, %cst_35 [1] : vector<8x8xf32> to vector<8xf32>
    %46 = vector.shape_cast %45 : vector<8xf32> to vector<8x1xf32>
    %47 = tpu.reciprocal %46 : vector<8x1xf32> -> vector<8x1xf32>
    %48 = vector.broadcast %47 : vector<8x1xf32> to vector<8x8xf32>
    %49 = arith.mulf %44, %48 : vector<8x8xf32>
    %cst_36 = arith.constant dense<0.000000e+00> : vector<8x8xf32>
    %50 = tpu.matmul %49, %38, %cst_36 {dimension_numbers = #tpu.dot_dimension_numbers<[1], [0], [0], [1], [0, 0, 1, 1], [], []>} : vector<8x8xf32>, vector<8x8xf32>, vector<8x8xf32> -> vector<8x8xf32>
    %51 = vector.extract_strided_slice %7 {offsets = [0, 0], sizes = [8, 32], strides = [1, 1]} : vector<32x32xf32> to vector<8x32xf32>
    %cst_37 = arith.constant dense<0.000000e+00> : vector<8x32xf32>
    %52 = tpu.matmul %50, %51, %cst_37 {dimension_numbers = #tpu.dot_dimension_numbers<[1], [0], [0], [1], [0, 0, 1, 1], [], []>} : vector<8x8xf32>, vector<8x32xf32>, vector<8x32xf32> -> vector<8x32xf32>
    %53 = arith.addf %34, %52 : vector<8x32xf32>
    %54 = arith.addf %35, %49 : vector<8x8xf32>
    %55 = vector.extract_strided_slice %23 {offsets = [0, 8], sizes = [8, 8], strides = [1, 1]} : vector<8x32xf32> to vector<8x8xf32>
    %56 = vector.extract_strided_slice %28 {offsets = [0, 8], sizes = [8, 8], strides = [1, 1]} : vector<8x32xf32> to vector<8x8xf32>
    %57 = vector.extract_strided_slice %33 {offsets = [0, 8], sizes = [8, 8], strides = [1, 1]} : vector<8x32xf32> to vector<8x8xf32>
    %cst_38 = arith.constant dense<0.000000e+00> : vector<8x8xf32>
    %58 = tpu.matmul %55, %56, %cst_38 {dimension_numbers = #tpu.dot_dimension_numbers<[1], [1], [0], [0], [0, 0, 1, 0], [], []>} : vector<8x8xf32>, vector<8x8xf32>, vector<8x8xf32> -> vector<8x8xf32>
    %cst_39 = arith.constant dense<0xFF800000> : vector<8xf32>
    %59 = vector.multi_reduction <maximumf>, %58, %cst_39 [1] : vector<8x8xf32> to vector<8xf32>
    %60 = vector.shape_cast %59 : vector<8xf32> to vector<8x1xf32>
    %61 = vector.broadcast %60 : vector<8x1xf32> to vector<8x8xf32>
    %62 = arith.subf %58, %61 : vector<8x8xf32>
    %63 = math.exp %62 : vector<8x8xf32>
    %cst_40 = arith.constant dense<0.000000e+00> : vector<8xf32>
    %64 = vector.multi_reduction <add>, %63, %cst_40 [1] : vector<8x8xf32> to vector<8xf32>
    %65 = vector.shape_cast %64 : vector<8xf32> to vector<8x1xf32>
    %66 = tpu.reciprocal %65 : vector<8x1xf32> -> vector<8x1xf32>
    %67 = vector.broadcast %66 : vector<8x1xf32> to vector<8x8xf32>
    %68 = arith.mulf %63, %67 : vector<8x8xf32>
    %cst_41 = arith.constant dense<0.000000e+00> : vector<8x8xf32>
    %69 = tpu.matmul %68, %57, %cst_41 {dimension_numbers = #tpu.dot_dimension_numbers<[1], [0], [0], [1], [0, 0, 1, 1], [], []>} : vector<8x8xf32>, vector<8x8xf32>, vector<8x8xf32> -> vector<8x8xf32>
    %70 = vector.extract_strided_slice %7 {offsets = [8, 0], sizes = [8, 32], strides = [1, 1]} : vector<32x32xf32> to vector<8x32xf32>
    %cst_42 = arith.constant dense<0.000000e+00> : vector<8x32xf32>
    %71 = tpu.matmul %69, %70, %cst_42 {dimension_numbers = #tpu.dot_dimension_numbers<[1], [0], [0], [1], [0, 0, 1, 1], [], []>} : vector<8x8xf32>, vector<8x32xf32>, vector<8x32xf32> -> vector<8x32xf32>
    %72 = arith.addf %53, %71 : vector<8x32xf32>
    %73 = arith.addf %54, %68 : vector<8x8xf32>
    %74 = vector.extract_strided_slice %23 {offsets = [0, 16], sizes = [8, 8], strides = [1, 1]} : vector<8x32xf32> to vector<8x8xf32>
    %75 = vector.extract_strided_slice %28 {offsets = [0, 16], sizes = [8, 8], strides = [1, 1]} : vector<8x32xf32> to vector<8x8xf32>
    %76 = vector.extract_strided_slice %33 {offsets = [0, 16], sizes = [8, 8], strides = [1, 1]} : vector<8x32xf32> to vector<8x8xf32>
    %cst_43 = arith.constant dense<0.000000e+00> : vector<8x8xf32>
    %77 = tpu.matmul %74, %75, %cst_43 {dimension_numbers = #tpu.dot_dimension_numbers<[1], [1], [0], [0], [0, 0, 1, 0], [], []>} : vector<8x8xf32>, vector<8x8xf32>, vector<8x8xf32> -> vector<8x8xf32>
    %cst_44 = arith.constant dense<0xFF800000> : vector<8xf32>
    %78 = vector.multi_reduction <maximumf>, %77, %cst_44 [1] : vector<8x8xf32> to vector<8xf32>
    %79 = vector.shape_cast %78 : vector<8xf32> to vector<8x1xf32>
    %80 = vector.broadcast %79 : vector<8x1xf32> to vector<8x8xf32>
    %81 = arith.subf %77, %80 : vector<8x8xf32>
    %82 = math.exp %81 : vector<8x8xf32>
    %cst_45 = arith.constant dense<0.000000e+00> : vector<8xf32>
    %83 = vector.multi_reduction <add>, %82, %cst_45 [1] : vector<8x8xf32> to vector<8xf32>
    %84 = vector.shape_cast %83 : vector<8xf32> to vector<8x1xf32>
    %85 = tpu.reciprocal %84 : vector<8x1xf32> -> vector<8x1xf32>
    %86 = vector.broadcast %85 : vector<8x1xf32> to vector<8x8xf32>
    %87 = arith.mulf %82, %86 : vector<8x8xf32>
    %cst_46 = arith.constant dense<0.000000e+00> : vector<8x8xf32>
    %88 = tpu.matmul %87, %76, %cst_46 {dimension_numbers = #tpu.dot_dimension_numbers<[1], [0], [0], [1], [0, 0, 1, 1], [], []>} : vector<8x8xf32>, vector<8x8xf32>, vector<8x8xf32> -> vector<8x8xf32>
    %89 = vector.extract_strided_slice %7 {offsets = [16, 0], sizes = [8, 32], strides = [1, 1]} : vector<32x32xf32> to vector<8x32xf32>
    %cst_47 = arith.constant dense<0.000000e+00> : vector<8x32xf32>
    %90 = tpu.matmul %88, %89, %cst_47 {dimension_numbers = #tpu.dot_dimension_numbers<[1], [0], [0], [1], [0, 0, 1, 1], [], []>} : vector<8x8xf32>, vector<8x32xf32>, vector<8x32xf32> -> vector<8x32xf32>
    %91 = arith.addf %72, %90 : vector<8x32xf32>
    %92 = arith.addf %73, %87 : vector<8x8xf32>
    %93 = vector.extract_strided_slice %23 {offsets = [0, 24], sizes = [8, 8], strides = [1, 1]} : vector<8x32xf32> to vector<8x8xf32>
    %94 = vector.extract_strided_slice %28 {offsets = [0, 24], sizes = [8, 8], strides = [1, 1]} : vector<8x32xf32> to vector<8x8xf32>
    %95 = vector.extract_strided_slice %33 {offsets = [0, 24], sizes = [8, 8], strides = [1, 1]} : vector<8x32xf32> to vector<8x8xf32>
    %cst_48 = arith.constant dense<0.000000e+00> : vector<8x8xf32>
    %96 = tpu.matmul %93, %94, %cst_48 {dimension_numbers = #tpu.dot_dimension_numbers<[1], [1], [0], [0], [0, 0, 1, 0], [], []>} : vector<8x8xf32>, vector<8x8xf32>, vector<8x8xf32> -> vector<8x8xf32>
    %cst_49 = arith.constant dense<0xFF800000> : vector<8xf32>
    %97 = vector.multi_reduction <maximumf>, %96, %cst_49 [1] : vector<8x8xf32> to vector<8xf32>
    %98 = vector.shape_cast %97 : vector<8xf32> to vector<8x1xf32>
    %99 = vector.broadcast %98 : vector<8x1xf32> to vector<8x8xf32>
    %100 = arith.subf %96, %99 : vector<8x8xf32>
    %101 = math.exp %100 : vector<8x8xf32>
    %cst_50 = arith.constant dense<0.000000e+00> : vector<8xf32>
    %102 = vector.multi_reduction <add>, %101, %cst_50 [1] : vector<8x8xf32> to vector<8xf32>
    %103 = vector.shape_cast %102 : vector<8xf32> to vector<8x1xf32>
    %104 = tpu.reciprocal %103 : vector<8x1xf32> -> vector<8x1xf32>
    %105 = vector.broadcast %104 : vector<8x1xf32> to vector<8x8xf32>
    %106 = arith.mulf %101, %105 : vector<8x8xf32>
    %cst_51 = arith.constant dense<0.000000e+00> : vector<8x8xf32>
    %107 = tpu.matmul %106, %95, %cst_51 {dimension_numbers = #tpu.dot_dimension_numbers<[1], [0], [0], [1], [0, 0, 1, 1], [], []>} : vector<8x8xf32>, vector<8x8xf32>, vector<8x8xf32> -> vector<8x8xf32>
    %108 = vector.extract_strided_slice %7 {offsets = [24, 0], sizes = [8, 32], strides = [1, 1]} : vector<32x32xf32> to vector<8x32xf32>
    %cst_52 = arith.constant dense<0.000000e+00> : vector<8x32xf32>
    %109 = tpu.matmul %107, %108, %cst_52 {dimension_numbers = #tpu.dot_dimension_numbers<[1], [0], [0], [1], [0, 0, 1, 1], [], []>} : vector<8x8xf32>, vector<8x32xf32>, vector<8x32xf32> -> vector<8x32xf32>
    %110 = arith.addf %91, %109 : vector<8x32xf32>
    %111 = arith.addf %92, %106 : vector<8x8xf32>
    %112 = vector.broadcast %15 : vector<1x32xf32> to vector<8x32xf32>
    %113 = arith.addf %110, %112 : vector<8x32xf32>
    %cst_53 = arith.constant 2.500000e-01 : f32
    %114 = vector.broadcast %cst_53 : f32 to vector<8x8xf32>
    %115 = arith.mulf %111, %114 : vector<8x8xf32>
    %116 = vector.extract_strided_slice %16 {offsets = [0, 1, 0], sizes = [8, 1, 32], strides = [1, 1, 1]} : vector<8x2x32xf32> to vector<8x1x32xf32>
    %117 = vector.shape_cast %116 : vector<8x1x32xf32> to vector<8x32xf32>
    %cst_54 = arith.constant dense<0.000000e+00> : vector<8x32xf32>
    %118 = tpu.matmul %117, %1, %cst_54 {dimension_numbers = #tpu.dot_dimension_numbers<[1], [0], [0], [1], [0, 0, 1, 1], [], []>} : vector<8x32xf32>, vector<32x32xf32>, vector<8x32xf32> -> vector<8x32xf32>
    %119 = vector.broadcast %9 : vector<1x32xf32> to vector<8x32xf32>
    %120 = arith.addf %118, %119 : vector<8x32xf32>
    %121 = vector.extract_strided_slice %17 {offsets = [0, 1, 0], sizes = [8, 1, 32], strides = [1, 1, 1]} : vector<8x2x32xf32> to vector<8x1x32xf32>
    %122 = vector.shape_cast %121 : vector<8x1x32xf32> to vector<8x32xf32>
    %cst_55 = arith.constant dense<0.000000e+00> : vector<8x32xf32>
    %123 = tpu.matmul %122, %3, %cst_55 {dimension_numbers = #tpu.dot_dimension_numbers<[1], [0], [0], [1], [0, 0, 1, 1], [], []>} : vector<8x32xf32>, vector<32x32xf32>, vector<8x32xf32> -> vector<8x32xf32>
    %124 = vector.broadcast %11 : vector<1x32xf32> to vector<8x32xf32>
    %125 = arith.addf %123, %124 : vector<8x32xf32>
    %126 = vector.extract_strided_slice %18 {offsets = [0, 1, 0], sizes = [8, 1, 32], strides = [1, 1, 1]} : vector<8x2x32xf32> to vector<8x1x32xf32>
    %127 = vector.shape_cast %126 : vector<8x1x32xf32> to vector<8x32xf32>
    %cst_56 = arith.constant dense<0.000000e+00> : vector<8x32xf32>
    %128 = tpu.matmul %127, %5, %cst_56 {dimension_numbers = #tpu.dot_dimension_numbers<[1], [0], [0], [1], [0, 0, 1, 1], [], []>} : vector<8x32xf32>, vector<32x32xf32>, vector<8x32xf32> -> vector<8x32xf32>
    %129 = vector.broadcast %13 : vector<1x32xf32> to vector<8x32xf32>
    %130 = arith.addf %128, %129 : vector<8x32xf32>
    %cst_57 = arith.constant 0.000000e+00 : f32
    %131 = vector.broadcast %cst_57 : f32 to vector<8x32xf32>
    %cst_58 = arith.constant 0.000000e+00 : f32
    %132 = vector.broadcast %cst_58 : f32 to vector<8x8xf32>
    %133 = vector.extract_strided_slice %120 {offsets = [0, 0], sizes = [8, 8], strides = [1, 1]} : vector<8x32xf32> to vector<8x8xf32>
    %134 = vector.extract_strided_slice %125 {offsets = [0, 0], sizes = [8, 8], strides = [1, 1]} : vector<8x32xf32> to vector<8x8xf32>
    %135 = vector.extract_strided_slice %130 {offsets = [0, 0], sizes = [8, 8], strides = [1, 1]} : vector<8x32xf32> to vector<8x8xf32>
    %cst_59 = arith.constant dense<0.000000e+00> : vector<8x8xf32>
    %136 = tpu.matmul %133, %134, %cst_59 {dimension_numbers = #tpu.dot_dimension_numbers<[1], [1], [0], [0], [0, 0, 1, 0], [], []>} : vector<8x8xf32>, vector<8x8xf32>, vector<8x8xf32> -> vector<8x8xf32>
    %cst_60 = arith.constant dense<0xFF800000> : vector<8xf32>
    %137 = vector.multi_reduction <maximumf>, %136, %cst_60 [1] : vector<8x8xf32> to vector<8xf32>
    %138 = vector.shape_cast %137 : vector<8xf32> to vector<8x1xf32>
    %139 = vector.broadcast %138 : vector<8x1xf32> to vector<8x8xf32>
    %140 = arith.subf %136, %139 : vector<8x8xf32>
    %141 = math.exp %140 : vector<8x8xf32>
    %cst_61 = arith.constant dense<0.000000e+00> : vector<8xf32>
    %142 = vector.multi_reduction <add>, %141, %cst_61 [1] : vector<8x8xf32> to vector<8xf32>
    %143 = vector.shape_cast %142 : vector<8xf32> to vector<8x1xf32>
    %144 = tpu.reciprocal %143 : vector<8x1xf32> -> vector<8x1xf32>
    %145 = vector.broadcast %144 : vector<8x1xf32> to vector<8x8xf32>
    %146 = arith.mulf %141, %145 : vector<8x8xf32>
    %cst_62 = arith.constant dense<0.000000e+00> : vector<8x8xf32>
    %147 = tpu.matmul %146, %135, %cst_62 {dimension_numbers = #tpu.dot_dimension_numbers<[1], [0], [0], [1], [0, 0, 1, 1], [], []>} : vector<8x8xf32>, vector<8x8xf32>, vector<8x8xf32> -> vector<8x8xf32>
    %148 = vector.extract_strided_slice %7 {offsets = [0, 0], sizes = [8, 32], strides = [1, 1]} : vector<32x32xf32> to vector<8x32xf32>
    %cst_63 = arith.constant dense<0.000000e+00> : vector<8x32xf32>
    %149 = tpu.matmul %147, %148, %cst_63 {dimension_numbers = #tpu.dot_dimension_numbers<[1], [0], [0], [1], [0, 0, 1, 1], [], []>} : vector<8x8xf32>, vector<8x32xf32>, vector<8x32xf32> -> vector<8x32xf32>
    %150 = arith.addf %131, %149 : vector<8x32xf32>
    %151 = arith.addf %132, %146 : vector<8x8xf32>
    %152 = vector.extract_strided_slice %120 {offsets = [0, 8], sizes = [8, 8], strides = [1, 1]} : vector<8x32xf32> to vector<8x8xf32>
    %153 = vector.extract_strided_slice %125 {offsets = [0, 8], sizes = [8, 8], strides = [1, 1]} : vector<8x32xf32> to vector<8x8xf32>
    %154 = vector.extract_strided_slice %130 {offsets = [0, 8], sizes = [8, 8], strides = [1, 1]} : vector<8x32xf32> to vector<8x8xf32>
    %cst_64 = arith.constant dense<0.000000e+00> : vector<8x8xf32>
    %155 = tpu.matmul %152, %153, %cst_64 {dimension_numbers = #tpu.dot_dimension_numbers<[1], [1], [0], [0], [0, 0, 1, 0], [], []>} : vector<8x8xf32>, vector<8x8xf32>, vector<8x8xf32> -> vector<8x8xf32>
    %cst_65 = arith.constant dense<0xFF800000> : vector<8xf32>
    %156 = vector.multi_reduction <maximumf>, %155, %cst_65 [1] : vector<8x8xf32> to vector<8xf32>
    %157 = vector.shape_cast %156 : vector<8xf32> to vector<8x1xf32>
    %158 = vector.broadcast %157 : vector<8x1xf32> to vector<8x8xf32>
    %159 = arith.subf %155, %158 : vector<8x8xf32>
    %160 = math.exp %159 : vector<8x8xf32>
    %cst_66 = arith.constant dense<0.000000e+00> : vector<8xf32>
    %161 = vector.multi_reduction <add>, %160, %cst_66 [1] : vector<8x8xf32> to vector<8xf32>
    %162 = vector.shape_cast %161 : vector<8xf32> to vector<8x1xf32>
    %163 = tpu.reciprocal %162 : vector<8x1xf32> -> vector<8x1xf32>
    %164 = vector.broadcast %163 : vector<8x1xf32> to vector<8x8xf32>
    %165 = arith.mulf %160, %164 : vector<8x8xf32>
    %cst_67 = arith.constant dense<0.000000e+00> : vector<8x8xf32>
    %166 = tpu.matmul %165, %154, %cst_67 {dimension_numbers = #tpu.dot_dimension_numbers<[1], [0], [0], [1], [0, 0, 1, 1], [], []>} : vector<8x8xf32>, vector<8x8xf32>, vector<8x8xf32> -> vector<8x8xf32>
    %167 = vector.extract_strided_slice %7 {offsets = [8, 0], sizes = [8, 32], strides = [1, 1]} : vector<32x32xf32> to vector<8x32xf32>
    %cst_68 = arith.constant dense<0.000000e+00> : vector<8x32xf32>
    %168 = tpu.matmul %166, %167, %cst_68 {dimension_numbers = #tpu.dot_dimension_numbers<[1], [0], [0], [1], [0, 0, 1, 1], [], []>} : vector<8x8xf32>, vector<8x32xf32>, vector<8x32xf32> -> vector<8x32xf32>
    %169 = arith.addf %150, %168 : vector<8x32xf32>
    %170 = arith.addf %151, %165 : vector<8x8xf32>
    %171 = vector.extract_strided_slice %120 {offsets = [0, 16], sizes = [8, 8], strides = [1, 1]} : vector<8x32xf32> to vector<8x8xf32>
    %172 = vector.extract_strided_slice %125 {offsets = [0, 16], sizes = [8, 8], strides = [1, 1]} : vector<8x32xf32> to vector<8x8xf32>
    %173 = vector.extract_strided_slice %130 {offsets = [0, 16], sizes = [8, 8], strides = [1, 1]} : vector<8x32xf32> to vector<8x8xf32>
    %cst_69 = arith.constant dense<0.000000e+00> : vector<8x8xf32>
    %174 = tpu.matmul %171, %172, %cst_69 {dimension_numbers = #tpu.dot_dimension_numbers<[1], [1], [0], [0], [0, 0, 1, 0], [], []>} : vector<8x8xf32>, vector<8x8xf32>, vector<8x8xf32> -> vector<8x8xf32>
    %cst_70 = arith.constant dense<0xFF800000> : vector<8xf32>
    %175 = vector.multi_reduction <maximumf>, %174, %cst_70 [1] : vector<8x8xf32> to vector<8xf32>
    %176 = vector.shape_cast %175 : vector<8xf32> to vector<8x1xf32>
    %177 = vector.broadcast %176 : vector<8x1xf32> to vector<8x8xf32>
    %178 = arith.subf %174, %177 : vector<8x8xf32>
    %179 = math.exp %178 : vector<8x8xf32>
    %cst_71 = arith.constant dense<0.000000e+00> : vector<8xf32>
    %180 = vector.multi_reduction <add>, %179, %cst_71 [1] : vector<8x8xf32> to vector<8xf32>
    %181 = vector.shape_cast %180 : vector<8xf32> to vector<8x1xf32>
    %182 = tpu.reciprocal %181 : vector<8x1xf32> -> vector<8x1xf32>
    %183 = vector.broadcast %182 : vector<8x1xf32> to vector<8x8xf32>
    %184 = arith.mulf %179, %183 : vector<8x8xf32>
    %cst_72 = arith.constant dense<0.000000e+00> : vector<8x8xf32>
    %185 = tpu.matmul %184, %173, %cst_72 {dimension_numbers = #tpu.dot_dimension_numbers<[1], [0], [0], [1], [0, 0, 1, 1], [], []>} : vector<8x8xf32>, vector<8x8xf32>, vector<8x8xf32> -> vector<8x8xf32>
    %186 = vector.extract_strided_slice %7 {offsets = [16, 0], sizes = [8, 32], strides = [1, 1]} : vector<32x32xf32> to vector<8x32xf32>
    %cst_73 = arith.constant dense<0.000000e+00> : vector<8x32xf32>
    %187 = tpu.matmul %185, %186, %cst_73 {dimension_numbers = #tpu.dot_dimension_numbers<[1], [0], [0], [1], [0, 0, 1, 1], [], []>} : vector<8x8xf32>, vector<8x32xf32>, vector<8x32xf32> -> vector<8x32xf32>
    %188 = arith.addf %169, %187 : vector<8x32xf32>
    %189 = arith.addf %170, %184 : vector<8x8xf32>
    %190 = vector.extract_strided_slice %120 {offsets = [0, 24], sizes = [8, 8], strides = [1, 1]} : vector<8x32xf32> to vector<8x8xf32>
    %191 = vector.extract_strided_slice %125 {offsets = [0, 24], sizes = [8, 8], strides = [1, 1]} : vector<8x32xf32> to vector<8x8xf32>
    %192 = vector.extract_strided_slice %130 {offsets = [0, 24], sizes = [8, 8], strides = [1, 1]} : vector<8x32xf32> to vector<8x8xf32>
    %cst_74 = arith.constant dense<0.000000e+00> : vector<8x8xf32>
    %193 = tpu.matmul %190, %191, %cst_74 {dimension_numbers = #tpu.dot_dimension_numbers<[1], [1], [0], [0], [0, 0, 1, 0], [], []>} : vector<8x8xf32>, vector<8x8xf32>, vector<8x8xf32> -> vector<8x8xf32>
    %cst_75 = arith.constant dense<0xFF800000> : vector<8xf32>
    %194 = vector.multi_reduction <maximumf>, %193, %cst_75 [1] : vector<8x8xf32> to vector<8xf32>
    %195 = vector.shape_cast %194 : vector<8xf32> to vector<8x1xf32>
    %196 = vector.broadcast %195 : vector<8x1xf32> to vector<8x8xf32>
    %197 = arith.subf %193, %196 : vector<8x8xf32>
    %198 = math.exp %197 : vector<8x8xf32>
    %cst_76 = arith.constant dense<0.000000e+00> : vector<8xf32>
    %199 = vector.multi_reduction <add>, %198, %cst_76 [1] : vector<8x8xf32> to vector<8xf32>
    %200 = vector.shape_cast %199 : vector<8xf32> to vector<8x1xf32>
    %201 = tpu.reciprocal %200 : vector<8x1xf32> -> vector<8x1xf32>
    %202 = vector.broadcast %201 : vector<8x1xf32> to vector<8x8xf32>
    %203 = arith.mulf %198, %202 : vector<8x8xf32>
    %cst_77 = arith.constant dense<0.000000e+00> : vector<8x8xf32>
    %204 = tpu.matmul %203, %192, %cst_77 {dimension_numbers = #tpu.dot_dimension_numbers<[1], [0], [0], [1], [0, 0, 1, 1], [], []>} : vector<8x8xf32>, vector<8x8xf32>, vector<8x8xf32> -> vector<8x8xf32>
    %205 = vector.extract_strided_slice %7 {offsets = [24, 0], sizes = [8, 32], strides = [1, 1]} : vector<32x32xf32> to vector<8x32xf32>
    %cst_78 = arith.constant dense<0.000000e+00> : vector<8x32xf32>
    %206 = tpu.matmul %204, %205, %cst_78 {dimension_numbers = #tpu.dot_dimension_numbers<[1], [0], [0], [1], [0, 0, 1, 1], [], []>} : vector<8x8xf32>, vector<8x32xf32>, vector<8x32xf32> -> vector<8x32xf32>
    %207 = arith.addf %188, %206 : vector<8x32xf32>
    %208 = arith.addf %189, %203 : vector<8x8xf32>
    %209 = vector.broadcast %15 : vector<1x32xf32> to vector<8x32xf32>
    %210 = arith.addf %207, %209 : vector<8x32xf32>
    %cst_79 = arith.constant 2.500000e-01 : f32
    %211 = vector.broadcast %cst_79 : f32 to vector<8x8xf32>
    %212 = arith.mulf %208, %211 : vector<8x8xf32>
    %213 = vector.shape_cast %113 : vector<8x32xf32> to vector<8x1x32xf32>
    %214 = vector.shape_cast %210 : vector<8x32xf32> to vector<8x1x32xf32>
    %215 = tpu.concatenate %213, %214 in 1 : vector<8x1x32xf32>, vector<8x1x32xf32> -> vector<8x2x32xf32>
    %c0_80 = arith.constant 0 : index
    %c0_81 = arith.constant 0 : index
    %c0_82 = arith.constant 0 : index
    %216 = vector.load %arg5[%c0_80, %c0_81, %c0_82] : memref<8x2x32xf32, #tpu.memory_space<vmem>>, vector<8x2x32xf32>
    tpu.vector_store %arg5[%c0_80, %c0_81, %c0_82], %215 {strides = array<i32>} : memref<8x2x32xf32, #tpu.memory_space<vmem>>, vector<8x2x32xf32>,
    %217 = vector.shape_cast %115 : vector<8x8xf32> to vector<1x8x8xf32>
    %218 = vector.shape_cast %212 : vector<8x8xf32> to vector<1x8x8xf32>
    %219 = tpu.concatenate %217, %218 in 0 : vector<1x8x8xf32>, vector<1x8x8xf32> -> vector<2x8x8xf32>
    %c0_83 = arith.constant 0 : index
    %c0_84 = arith.constant 0 : index
    %c0_85 = arith.constant 0 : index
    %220 = vector.load %arg6[%c0_83, %c0_84, %c0_85] : memref<2x8x8xf32, #tpu.memory_space<vmem>>, vector<2x8x8xf32>
    tpu.vector_store %arg6[%c0_83, %c0_84, %c0_85], %219 {strides = array<i32>} : memref<2x8x8xf32, #tpu.memory_space<vmem>>, vector<2x8x8xf32>,
    return
  }
}

</mosaic_0001>

<bundles_post_ra>
// kernel: multihead_attention.1
= control target key start
LH: loop header
LB: loop body
LE: loop exit
PB: predicated region body
PF: predicated region fallthrough
CT: control target
= control target key end

     0   :  { %12 = vsyncpa [#allocation3], 0  ;;  %s2027_s0 = inlined_call_operand.hbm [shape: f32[8,2,32], index: 0, kind: input, shape index: {}]   ;;  %s2028_s1 = inlined_call_operand.hbm [shape: f32[8,2,32], index: 1, kind: input, shape index: {}]   ;;  %s2029_s2 = inlined_call_operand.hbm [shape: f32[8,2,32], index: 2, kind: input, shape index: {}]   ;;  %s2030_s3 = inlined_call_operand.hbm [shape: f32[4,32,32], index: 3, kind: input, shape index: {}]   ;;  %s2031_s4 = inlined_call_operand.hbm [shape: f32[4,1,32], index: 4, kind: input, shape index: {}]   ;;  %s2032_s5 = inlined_call_operand.hbm [shape: f32[8,2,32], index: 5, kind: output, shape index: {0}]   ;;  %s2033_s6 = inlined_call_operand.hbm [shape: f32[2,8,8], index: 6, kind: output, shape index: {1}]  }
   0x1   :  { %13 = vsyncpa [#allocation6], 0 }
   0x2   :  { %14 = vsyncpa [#allocation9], 0 }
   0x3   :  { %15 = vsyncpa [#allocation4], 0 }
   0x4   :  { %16 = vsyncpa [#allocation13], 0  ;;  %s34_s23 = sshll.u32 %s2028_s1, 4  ;;  %s1595_s24 = smov [#allocation5]   ;;  %s35_s23 = int_to_ptr.hbm [resolvable:$true] %s34_s23 }
   0x5   :  { %s36_s25 = sshll.u32 %s1595_s24, 4  ;;  %s60_s28 = sshll.u32 %s2030_s3, 4  ;;  %s37_s25 = int_to_ptr.vmem [resolvable:$true] %s36_s25  ;;  %s61_s28 = int_to_ptr.hbm [resolvable:$true] %s60_s28 }
   0x6   :  { %s1596_s29 = smov 32   ;;  %s1597_s30 = smov 2  }
   0x7   :  { %42 = dma.hbm_to_vmem [thread:$0]  %s35_s23, 256, %s37_s25, [#allocation6], %s1596_s29, %s1596_s29, %s1597_s30  }
   0x8   :  { %s1598_s7 = smov [#allocation8]   ;;  %s1599_s9 = smov 128  }
   0x9   :  { %s62_s8 = sshll.u32 %s1598_s7, 4  ;;  %s1600_s1 = smov 8   ;;  %s63_s8 = int_to_ptr.vmem [resolvable:$true] %s62_s8 }
   0xa   :  { %68 = dma.hbm_to_vmem [thread:$0]  %s61_s28, 2048, %s63_s8, [#allocation9], %s1599_s9, %s1599_s9, %s1600_s1  }
   0xb   :  { %s21_s3 = sshll.u32 %s2027_s0, 4  ;;  %s1601_s12 = smov [#allocation2]   ;;  %s22_s3 = int_to_ptr.hbm [resolvable:$true] %s21_s3 }
   0xc   :  { %s23_s13 = sshll.u32 %s1601_s12, 4  ;;  %s47_s16 = sshll.u32 %s2029_s2, 4  ;;  %s24_s13 = int_to_ptr.vmem [resolvable:$true] %s23_s13  ;;  %s48_s16 = int_to_ptr.hbm [resolvable:$true] %s47_s16 }
   0xd   :  { %29 = dma.hbm_to_vmem [thread:$0]  %s22_s3, 256, %s24_s13, [#allocation3], %s1596_s29, %s1596_s29, %s1597_s30  }
   0xe   :  { %s1602_s17 = smov [#allocation7]   ;;  %s73_s21 = sshll.u32 %s2031_s4, 4  ;;  %s74_s21 = int_to_ptr.hbm [resolvable:$true] %s73_s21 }
   0xf   :  { %s49_s18 = sshll.u32 %s1602_s17, 4  ;;  %s1603_s0 = smov [#allocation10]   ;;  %s50_s18 = int_to_ptr.vmem [resolvable:$true] %s49_s18 }
  0x10   :  { %55 = dma.hbm_to_vmem [thread:$0]  %s48_s16, 256, %s50_s18, [#allocation6], %s1596_s29, %s1596_s29, %s1597_s30  }
  0x11   :  { %s75_s22 = sshll.u32 %s1603_s0, 4  ;;  %s1604_s2 = smov 16   ;;  %s76_s22 = int_to_ptr.vmem [resolvable:$true] %s75_s22 }
  0x12   :  { %s1605_s23 = smov 1  }
  0x13   :  { %81 = dma.hbm_to_vmem [thread:$0]  %s74_s21, 64, %s76_s22, [#allocation9], %s1604_s2, %s1604_s2, %s1605_s23  }
  0x14   :  { %1585 = dma.done.wait [#allocation3], 256  }
  0x15   :  { %1586 = vsyncadd [#allocation3], 4294967040 }
  0x16   :  { %1587 = dma.done.wait [#allocation6], 512  }
  0x17   :  { %1588 = vsyncadd [#allocation6], 4294966784 }
  0x18   :  { %1589 = dma.done.wait [#allocation9], 2112  }
  0x19   :  { %1590 = vsyncadd [#allocation9], 4294965184  ;;  %v1673_v0 = vld [vmem:[#allocation8 + $0x38] sm:$0xff]  ;;  %v1675_v1 = vld [vmem:[#allocation8 + $0x30] sm:$0xff]  ;;  %vm164_vm0 = vcmask 1041409   ;;  %vm167_vm1 = vcmask 1042434  }
  0x1a   :  { %v1677_v2 = vld [vmem:[#allocation8 + $0x18] sm:$0xff]  ;;  %246 = vmatpush.msra.mxu1 %v1673_v0  ;;  %v1681_v3 = vld [vmem:[#allocation8 + $0x28] sm:$0xff]  ;;  %v1683_v4 = vld [vmem:[#allocation8 + $0x10] sm:$0xff]  ;;  %vm170_vm2 = vcmask 1043459   ;;  %vm173_vm3 = vcmask 1044484   ;;  %vm176_vm4 = vcmask 1045509  }
  0x1b   :  { %199 = vmatpush.msra.mxu0 %v1677_v2  ;;  %v1685_v5 = vld [vmem:[#allocation8 + $0x20] sm:$0xff]  ;;  %v1687_v6 = vld [vmem:[#allocation8 + $0x8] sm:$0xff]  ;;  %vm179_vm5 = vcmask 1046534   ;;  %vm182_vm6 = vcmask 1047559   ;;  %v1720_v22 = vld [vmem:[#allocation2 + $0x2] sm:$0x3] }
  0x1c   :  { %v1689_v7 = vld [vmem:[#allocation5 + $0x2] sm:$0x3]  ;;  %247 = vmatpush.msra.mxu1 %v1675_v1  ;;  %v1693_v8 = vld [vmem:[#allocation5 + $0x4] sm:$0x3]  ;;  %v1695_v9 = vld [vmem:[#allocation5 + $0x6] sm:$0x3] }
  0x1d   :  { %200 = vmatpush.msra.mxu0 %v1683_v4  ;;  %v1697_v10 = vld [vmem:[#allocation5 + $0x8] sm:$0x3]  ;;  %v1699_v11 = vld [vmem:[#allocation5] sm:$0x3]  ;;  %v1701_v12 = vld [vmem:[#allocation5 + $0xa] sm:$0x3] }
  0x1e   :  { %v1703_v13 = vld [vmem:[#allocation5 + $0xc] sm:$0x3]  ;;  %248 = vmatpush.msra.mxu1 %v1681_v3  ;;  %v1707_v14 = vld [vmem:[#allocation5 + $0xe] sm:$0x3]  ;;  %v218_v15 = vrot.slane %v1689_v7, 7  ;;  %v220_v16 = vrot.slane %v1693_v8, 6 }
  0x1f   :  { %201 = vmatpush.msra.mxu0 %v1687_v6  ;;  %v222_v17 = vrot.slane %v1695_v9, 5  ;;  %v1712_v18 = vld [vmem:[#allocation8] sm:$0xff]  ;;  %v224_v19 = vrot.slane %v1697_v10, 4  ;;  %v226_v21 = vrot.slane %v1701_v12, 3  ;;  %v228_v24 = vrot.slane %v1703_v13, 2  ;;  %s1606_s4 = smov 112  }
  0x20   :  { %249 = vmatpush.msra.mxu1 %v1685_v5  ;;  %v219_v20 = vsel %vm164_vm0, %v218_v15, %v1699_v11  ;;  %v230_v25 = vrot.slane %v1707_v14, 1  ;;  %v1725_v26 = vld [vmem:[#allocation2] sm:$0x3]  ;;  %v1727_v27 = vld [vmem:[#allocation2 + $0x4] sm:$0x3]  ;;  %vm184_vm7 = vcmask 261120  }
  0x21   :  { %202 = vmatpush.msra.mxu0 %v1712_v18  ;;  %v221_v23 = vsel %vm167_vm1, %v220_v16, %v219_v20  ;;  %v1730_v29 = vld [vmem:[#allocation2 + $0x6] sm:$0x3]  ;;  %v1732_v30 = vld [vmem:[#allocation2 + $0x8] sm:$0x3]  ;;  %v1734_v31 = vld [vmem:[#allocation2 + $0xa] sm:$0x3] }
  0x22   :  { %v223_v28 = vsel %vm170_vm2, %v222_v17, %v221_v23  ;;  %v1737_v33 = vld [vmem:[#allocation2 + $0xc] sm:$0x3]  ;;  %v163_v34 = vrot.slane %v1720_v22, 7  ;;  %v166_v35 = vrot.slane %v1727_v27, 6  ;;  %v1742_v37 = vld [vmem:[#allocation2 + $0xe] sm:$0x3] }
  0x23   :  { %v225_v32 = vsel %vm173_vm3, %v224_v19, %v223_v28  ;;  %v169_v38 = vrot.slane %v1730_v29, 5  ;;  %v172_v39 = vrot.slane %v1732_v30, 4  ;;  %v175_v42 = vrot.slane %v1734_v31, 3  ;;  %v1761_v52 = vld [vmem:[#allocation10 + $0x1] ss:$0 sm:$0xff]  ;;  %s1607_s24 = smov 120  }
  0x24   :  { %v227_v36 = vsel %vm176_vm4, %v226_v21, %v225_v32  ;;  %v165_v41 = vsel %vm164_vm0, %v163_v34, %v1725_v26  ;;  %v178_v45 = vrot.slane %v1737_v33, 2  ;;  %v181_v47 = vrot.slane %v1742_v37, 1  ;;  %v1766_v55 = vld [vmem:[#allocation10] ss:$0 sm:$0xff]  ;;  %s1608_s25 = smov 104   ;;  %v1789_v19 = vld [vmem:[#allocation8 + $0x58] sm:$0xff] }
  0x25   :  { %v229_v40 = vsel %vm179_vm5, %v228_v24, %v227_v36  ;;  %v168_v44 = vsel %vm167_vm1, %v166_v35, %v165_v41  ;;  %vm301_vm8 = vcmask 64512   ;;  %v1784_v15 = vld [vmem:[#allocation7 + $0x2] sm:$0x3]  ;;  %v1786_v16 = vld [vmem:[#allocation7 + $0x4] sm:$0x3]  ;;  %293 = vmatpush.msra.mxu2 %v1789_v19  ;;  %s1609_s26 = smov [#allocation12]  }
  0x26   :  { %v231_v43 = vsel %vm182_vm6, %v230_v25, %v229_v40  ;;  %v171_v46 = vsel %vm170_vm2, %v169_v38, %v168_v44  ;;  %v265_v17 = vrot.slane %v1784_v15, 7  ;;  %v1791_v20 = vld [vmem:[#allocation7] sm:$0x3]  ;;  %v1793_v21 = vld [vmem:[#allocation7 + $0x6] sm:$0x3]  ;;  %v267_v23 = vrot.slane %v1786_v16, 6 }
  0x27   :  { %1328 = vmatmul.msk.f32.vlgmr.msra.gmra.mxu1 %vm184_vm7, %v231_v43  ;;  %v174_v48 = vsel %vm173_vm3, %v172_v39, %v171_v46  ;;  %v1797_v24 = vld [vmem:[#allocation8 + $0x50] sm:$0xff]  ;;  %v1799_v25 = vld [vmem:[#allocation8 + $0x48] sm:$0xff]  ;;  %v269_v32 = vrot.slane %v1793_v21, 5  ;;  %v1804_v34 = vld [vmem:[#allocation7 + $0x8] sm:$0x3]  ;;  %s1305_s27 = sshll.u32 %s1609_s26, 4  ;;  %s1306_s27 = int_to_ptr.vmem [resolvable:$true] %s1305_s27 }
  0x28   :  { %v177_v49 = vsel %vm176_vm4, %v175_v42, %v174_v48  ;;  %v266_v28 = vsel %vm164_vm0, %v265_v17, %v1791_v20  ;;  %v1806_v35 = vld [vmem:[#allocation7 + $0xa] sm:$0x3]  ;;  %v1808_v36 = vld [vmem:[#allocation7 + $0xc] sm:$0x3]  ;;  %294 = vmatpush.msra.mxu2 %v1797_v24  ;;  %v1812_v39 = vld [vmem:[#allocation7 + $0xe] sm:$0x3] }
  0x29   :  { %v180_v50 = vsel %vm179_vm5, %v178_v45, %v177_v49  ;;  %v268_v38 = vsel %vm167_vm1, %v267_v23, %v266_v28  ;;  %v271_v41 = vrot.slane %v1804_v34, 4  ;;  %v273_v42 = vrot.slane %v1806_v35, 3  ;;  %v1818_v44 = vld [vmem:[#allocation8 + $0x40] sm:$0xff]  ;;  %s1307_s8 = sshll.u32 %s2033_s6, 4  ;;  %s1610_s6 = smov [#allocation11]   ;;  %s1308_s8 = int_to_ptr.hbm [resolvable:$true] %s1307_s8 }
  0x2a   :  { %v183_v51 = vsel %vm182_vm6, %v181_v47, %v180_v50  ;;  %v270_v40 = vsel %vm170_vm2, %v269_v32, %v268_v38  ;;  %v275_v43 = vrot.slane %v1808_v36, 2  ;;  %v277_v45 = vrot.slane %v1812_v39, 1  ;;  %295 = vmatpush.msra.mxu2 %v1799_v25  ;;  %v1838_v38 = vld [vmem:[#allocation8 + $0x60] sm:$0xff]  ;;  %s1294_s11 = sshll.u32 %s2032_s5, 4  ;;  %s1295_s11 = int_to_ptr.hbm [resolvable:$true] %s1294_s11 }
  0x2b   :  { %1327 = vmatmul.msk.f32.vlgmr.msra.gmra.mxu0 %vm184_vm7, %v183_v51  ;;  %v272_v46 = vsel %vm173_vm3, %v271_v41, %v270_v40 }
  0x2c   :  { %v274_v47 = vsel %vm176_vm4, %v273_v42, %v272_v46  ;;  %296 = vmatpush.msra.mxu2 %v1818_v44 }
  0x2d   :  { %v276_v48 = vsel %vm179_vm5, %v275_v43, %v274_v47 }
  0x2e   :  { %v278_v49 = vsel %vm182_vm6, %v277_v45, %v276_v48 }
  0x2f   :  { %1329 = vmatmul.msk.f32.vlgmr.msra.gmra.mxu2 %vm184_vm7, %v278_v49 }
  0xa4   :  { %v251_v53 = vpop.f32.mrf.mxu1 }
  0xa5   :  { %v1764_v54 = vadd.f32 %v1761_v52, %v251_v53 }
  0xa7   :  { %504 = vrot.lane.b32.xlu2 %v1764_v54, %s1606_s4  ;;  %378 = vrot.lane.b32.xlu1 %v1764_v54, %s1607_s24 }
  0xa8   :  { %1330 = vmatpush.xpose.msk.msra.mxu3 %vm301_vm8, %v1764_v54  ;;  %v204_v56 = vpop.f32.mrf.mxu0 }
  0xa9   :  { %v205_v57 = vadd.f32 %v1766_v55, %v204_v56 }
  0xab   :  { %1331 = vmatmul.msk.f32.vlgmr.msra.gmra.mxu3 %vm301_vm8, %v205_v57 }
  0xaf   :  { %502 = vrot.lane.b32.xlu2 %v205_v57, %s1606_s4  ;;  %376 = vrot.lane.b32.xlu1 %v205_v57, %s1607_s24 }
  0xb2   :  { %v298_v28 = vpop.f32.mrf.mxu2 }
  0xb7   :  { %605 = vrot.lane.b32.xlu1 %v205_v57, %s1608_s25 }
 0x101   :  { %v505_v59 = vpop.permute.xlu2 %504 }
 0x109   :  { %v503_v61 = vpop.permute.xlu2 %502 }
 0x119   :  { %v379_v58 = vpop.permute.xlu1 %378 }
 0x11a   :  { %1333 = vmatpush.xpose.msk.msrb.mxu0 %vm301_vm8, %v379_v58 }
 0x11e   :  { %1338 = vmatpush.xpose.msk.msra.mxu0 %vm301_vm8, %v505_v59 }
 0x121   :  { %v377_v60 = vpop.permute.xlu1 %376 }
 0x122   :  { %1334 = vmatmul.msk.f32.vlgmr.msrb.gmra.mxu0 %vm301_vm8, %v377_v60 }
 0x129   :  { %v1835_v17 = vpop.permute.xlu1 %605 }
 0x12a   :  { %1339 = vmatmul.msk.f32.vlgmr.msra.gmra.mxu0 %vm301_vm8, %v503_v61 }
 0x12e   :  { %v325_v62 = vpop.f32.mrf.mxu3 }
 0x12f   :  { %v328_v63 = vsel %vm301_vm8, %v325_v62, -inf }
 0x130   :  { %329 = vmax.xlane.f32.xlu0 %v328_v63  ;;  %v1833_v63 = vld [vmem:[#allocation10 + $0x2] ss:$0 sm:$0xff] }
 0x131   :  { %v299_v32 = vadd.f32 %v1833_v63, %v298_v28 }
 0x133   :  { %370 = vmatpush.msrb.mxu3 %v299_v32 }
 0x135   :  { %496 = vmatpush.msra.mxu3 %v1838_v38 }
 0x19f   :  { %v401_v50 = vpop.f32.mrf.mxu0 }
 0x1a0   :  { %v404_v51 = vsel %vm301_vm8, %v401_v50, -inf }
 0x1a1   :  { %405 = vmax.xlane.f32.xlu2 %v404_v51 }
 0x1a3   :  { %v330_v53 = vpop.xlane.xlu0 %329 }
 0x1a4   :  { %v331_v56 = vsub.f32 %v325_v62, %v330_v53 }
 0x1a6   :  { %v332_v57 = vmul.f32 1.442695, %v331_v56 }
 0x1a7   :  { %v527_v58 = vpop.f32.mrf.mxu0 }
 0x1a8   :  { %v530_v59 = vsel %vm301_vm8, %v527_v58, -inf  ;;  %1385 = vpow2.f32 %v332_v57 }
 0x1a9   :  { %531 = vmax.xlane.f32.xlu1 %v530_v59 }
 0x1ae   :  { %v1386_v60 = vpop.eup %1385 }
 0x1af   :  { %v334_v61 = vsel %vm301_vm8, %v1386_v60, 0.0 }
 0x1b0   :  { %335 = vadd.xlane.f32.xlu0 %v334_v61 }
 0x1c2   :  { %554 = vrot.lane.b32.xlu1 %v299_v32, %s1606_s4 }
 0x1c4   :  { %607 = vrot.lane.b32.xlu0 %v1764_v54, %s1608_s25 }
 0x214   :  { %v406_v23 = vpop.xlane.xlu2 %405 }
 0x215   :  { %v407_v62 = vsub.f32 %v401_v50, %v406_v23 }
 0x217   :  { %v408_v40 = vmul.f32 1.442695, %v407_v62 }
 0x219   :  { %1387 = vpow2.f32 %v408_v40 }
 0x21c   :  { %v532_v41 = vpop.xlane.xlu1 %531 }
 0x21d   :  { %v533_v54 = vsub.f32 %v527_v58, %v532_v41 }
 0x21f   :  { %v1388_v42 = vpop.eup %1387  ;;  %v534_v43 = vmul.f32 1.442695, %v533_v54 }
 0x220   :  { %v410_v45 = vsel %vm301_vm8, %v1388_v42, 0.0 }
 0x221   :  { %1389 = vpow2.f32 %v534_v43  ;;  %411 = vadd.xlane.f32.xlu0 %v410_v45 }
 0x223   :  { %v336_v46 = vpop.xlane.xlu0 %335 }
 0x224   :  { %1391 = vrcp.f32 %v336_v46  ;;  %v348_v53 = vand.u32 2147483648, %v336_v46  ;;  %v346_v57 = vand.u32 2147483647, %v336_v46  ;;  %vm342_vm10 = vweird.f32 %v336_v46 }
 0x226   :  { %v349_v59 = vor.u32 1.1754944e-38, %v348_v53  ;;  %vm347_vm12 = vcmp.eq.f32.partialorder %v346_v57, 8.507059e+37 }
 0x227   :  { %v1843_v47 = vpop.eup %1389 }
 0x228   :  { %v536_v48 = vsel %vm301_vm8, %v1843_v47, 0.0 }
 0x229   :  { %537 = vadd.xlane.f32.xlu2 %v536_v48 }
 0x22a   :  { %v1392_v49 = vpop.eup %1391 }
 0x22b   :  { %v338_v50 = vmul.f32 %v1392_v49, %v336_v46  ;;  %vm343_vm9 = vweird.f32 %v1392_v49 }
 0x22c   :  { %vm344_vm11 = vmor %vm342_vm10, %vm343_vm9 }
 0x22d   :  { %v339_v51 = vsub.f32 1.0, %v338_v50 }
 0x22f   :  { %v340_v56 = vmul.f32 %v1392_v49, %v339_v51 }
 0x231   :  { %v341_v58 = vadd.f32 %v1392_v49, %v340_v56 }
 0x233   :  { %v345_v61 = vsel %vm344_vm11, %v1392_v49, %v341_v58 }
 0x234   :  { %v350_v23 = vsel %vm347_vm12, %v349_v59, %v345_v61  ;;  %v555_v53 = vpop.permute.xlu1 %554 }
 0x235   :  { %v351_v28 = vmul.f32 %v1386_v60, %v350_v23 }
 0x236   :  { %v608_v62 = vpop.permute.xlu0 %607 }
 0x237   :  { %1332 = vmatmul.msk.f32.vlgmr.msrb.gmra.mxu3 %vm301_vm8, %v351_v28 }
 0x238   :  { %1342 = vmatpush.xpose.msk.msrb.mxu3 %vm301_vm8, %v608_v62 }
 0x241   :  { %429 = vrot.lane.b32.xlu2 %v299_v32, %s1607_s24 }
 0x249   :  { %657 = vrot.lane.b32.xlu2 %v299_v32, %s1608_s25 }
 0x294   :  { %v412_v40 = vpop.xlane.xlu0 %411 }
 0x295   :  { %1393 = vrcp.f32 %v412_v40  ;;  %v424_v46 = vand.u32 2147483648, %v412_v40  ;;  %v422_v60 = vand.u32 2147483647, %v412_v40  ;;  %vm418_vm14 = vweird.f32 %v412_v40 }
 0x297   :  { %v425_v51 = vor.u32 1.1754944e-38, %v424_v46  ;;  %vm423_vm9 = vcmp.eq.f32.partialorder %v422_v60, 8.507059e+37 }
 0x29b   :  { %v1394_v41 = vpop.eup %1393 }
 0x29c   :  { %v414_v54 = vmul.f32 %v1394_v41, %v412_v40  ;;  %v538_v43 = vpop.xlane.xlu2 %537  ;;  %vm419_vm13 = vweird.f32 %v1394_v41 }
 0x29d   :  { %1395 = vrcp.f32 %v538_v43  ;;  %vm420_vm15 = vmor %vm418_vm14, %vm419_vm13  ;;  %v550_v23 = vand.u32 2147483648, %v538_v43  ;;  %vm544_vm11 = vweird.f32 %v538_v43 }
 0x29e   :  { %v415_v45 = vsub.f32 1.0, %v414_v54  ;;  %v548_v54 = vand.u32 2147483647, %v538_v43 }
 0x2a0   :  { %v416_v48 = vmul.f32 %v1394_v41, %v415_v45  ;;  %v551_v45 = vor.u32 1.1754944e-38, %v550_v23  ;;  %vm549_vm13 = vcmp.eq.f32.partialorder %v548_v54, 8.507059e+37  ;;  %v723_v23 = vrot.slane %v1737_v33, 3 }
 0x2a1   :  { %v725_v54 = vrot.slane %v1742_v37, 2 }
 0x2a2   :  { %v417_v49 = vadd.f32 %v1394_v41, %v416_v48 }
 0x2a3   :  { %v1396_v50 = vpop.eup %1395 }
 0x2a4   :  { %v540_v56 = vmul.f32 %v1396_v50, %v538_v43  ;;  %v430_v32 = vpop.permute.xlu2 %429  ;;  %v421_v57 = vsel %vm420_vm15, %v1394_v41, %v417_v49  ;;  %vm545_vm10 = vweird.f32 %v1396_v50 }
 0x2a5   :  { %450 = vmatpush.msrb.mxu1 %v430_v32  ;;  %v426_v58 = vsel %vm423_vm9, %v425_v51, %v421_v57  ;;  %vm546_vm12 = vmor %vm544_vm11, %vm545_vm10  ;;  %v715_v32 = vrot.slane %v1727_v27, 7  ;;  %v717_v57 = vrot.slane %v1730_v29, 6 }
 0x2a6   :  { %v541_v59 = vsub.f32 1.0, %v540_v56  ;;  %v427_v61 = vmul.f32 %v1388_v42, %v426_v58  ;;  %v719_v58 = vrot.slane %v1732_v30, 5 }
 0x2a7   :  { %575 = vmatpush.msra.mxu1 %v555_v53 }
 0x2a8   :  { %v542_v62 = vmul.f32 %v1396_v50, %v541_v59  ;;  %1335 = vmatmul.msk.f32.vlgmr.msrb.gmra.mxu1 %vm301_vm8, %v427_v61  ;;  %v501_v49 = vadd.f32 %v427_v61, %v351_v28  ;;  %v721_v59 = vrot.slane %v1734_v31, 4 }
 0x2aa   :  { %v543_v40 = vadd.f32 %v1396_v50, %v542_v62 }
 0x2ac   :  { %v547_v46 = vsel %vm546_vm12, %v1396_v50, %v543_v40  ;;  %v658_v48 = vpop.permute.xlu2 %657  ;;  %v761_v50 = vrot.slane %v1707_v14, 2  ;;  %v713_v14 = vrot.slane %v1725_v26, 1 }
 0x2ad   :  { %v552_v60 = vsel %vm549_vm13, %v551_v45, %v547_v46  ;;  %678 = vmatpush.msrb.mxu0 %v658_v48 }
 0x2ae   :  { %v553_v41 = vmul.f32 %v1843_v47, %v552_v60  ;;  %v759_v47 = vrot.slane %v1703_v13, 3  ;;  %v714_v61 = vsel %vm164_vm0, %v1720_v22, %v713_v14  ;;  %v797_v14 = vrot.slane %v1812_v39, 2 }
 0x2af   :  { %813 = vmatpush.msra.mxu0 %v1789_v19  ;;  %v1867_v19 = vld [vmem:[#allocation8 + $0x68] sm:$0xff]  ;;  %v716_v62 = vsel %vm167_vm1, %v715_v32, %v714_v61 }
 0x2b0   :  { %v1854_v42 = vadd.f32 %v553_v41, %v501_v49  ;;  %1340 = vmatmul.msk.f32.vlgmr.msra.gmra.mxu1 %vm301_vm8, %v553_v41  ;;  %473 = vmatpush.msrb.mxu2 %v1867_v19  ;;  %v718_v40 = vsel %vm170_vm2, %v717_v57, %v716_v62 }
 0x2b1   :  { %814 = vmatpush.msra.mxu0 %v1797_v24  ;;  %v1870_v24 = vld [vmem:[#allocation8 + $0x70] sm:$0xff]  ;;  %v720_v26 = vsel %vm173_vm3, %v719_v58, %v718_v40 }
 0x2b2   :  { %598 = vmatpush.msra.mxu2 %v1870_v24  ;;  %v722_v27 = vsel %vm176_vm4, %v721_v59, %v720_v26 }
 0x2b3   :  { %815 = vmatpush.msra.mxu0 %v1799_v25  ;;  %v724_v29 = vsel %vm179_vm5, %v723_v23, %v722_v27 }
 0x2b4   :  { %v726_v30 = vsel %vm182_vm6, %v725_v54, %v724_v29 }
 0x2b5   :  { %816 = vmatpush.msra.mxu0 %v1818_v44  ;;  %v749_v44 = vrot.slane %v1699_v11, 1 }
 0x2ba   :  { %v372_v43 = vpop.f32.mrf.mxu3 }
 0x2bb   :  { %1337 = vmatmul.msk.f32.vlgmr.msra.gmra.mxu3 %vm301_vm8, %v372_v43 }
 0x2bc   :  { %777 = vmatpush.msra.mxu3 %v1673_v0 }
 0x2be   :  { %778 = vmatpush.msra.mxu3 %v1675_v1 }
 0x2c0   :  { %779 = vmatpush.msra.mxu3 %v1681_v3 }
 0x2c2   :  { %780 = vmatpush.msra.mxu3 %v1685_v5 }
 0x2c3   :  { %1343 = vmatmul.msk.f32.vlgmr.msrb.gmra.mxu3 %vm301_vm8, %v1835_v17  ;;  %v751_v17 = vrot.slane %v1693_v8, 7 }
 0x325   :  { %v452_v25 = vpop.f32.mrf.mxu1 }
 0x326   :  { %1336 = vmatmul.msk.f32.vlgmr.msrb.gmra.mxu2 %vm301_vm8, %v452_v25 }
 0x327   :  { %741 = vmatpush.msrb.mxu2 %v1677_v2  ;;  %v753_v2 = vrot.slane %v1695_v9, 6 }
 0x329   :  { %742 = vmatpush.msrb.mxu2 %v1683_v4  ;;  %v755_v4 = vrot.slane %v1697_v10, 5 }
 0x32b   :  { %743 = vmatpush.msrb.mxu2 %v1687_v6  ;;  %v757_v6 = vrot.slane %v1701_v12, 4 }
 0x32d   :  { %v577_v0 = vpop.f32.mrf.mxu1  ;;  %744 = vmatpush.msrb.mxu2 %v1712_v18  ;;  %v750_v18 = vsel %vm164_vm0, %v1689_v7, %v749_v44 }
 0x32e   :  { %1341 = vmatmul.msk.f32.vlgmr.msra.gmra.mxu2 %vm301_vm8, %v577_v0  ;;  %v752_v28 = vsel %vm167_vm1, %v751_v17, %v750_v18 }
 0x32f   :  { %v754_v51 = vsel %vm170_vm2, %v753_v2, %v752_v28 }
 0x330   :  { %v756_v11 = vsel %vm173_vm3, %v755_v4, %v754_v51 }
 0x331   :  { %v758_v8 = vsel %vm176_vm4, %v757_v6, %v756_v11  ;;  %v1923_v6 = vld [vmem:[#allocation8 + $0x78] sm:$0xff] }
 0x332   :  { %v760_v9 = vsel %vm179_vm5, %v759_v47, %v758_v8  ;;  %701 = vmatpush.msrb.mxu1 %v1923_v6 }
 0x333   :  { %v762_v10 = vsel %vm182_vm6, %v761_v50, %v760_v9 }
 0x334   :  { %1347 = vmatmul.msk.f32.vlgmr.msra.gmra.mxu3 %vm184_vm7, %v762_v10 }
 0x336   :  { %1346 = vmatmul.msk.f32.vlgmr.msrb.gmra.mxu2 %vm184_vm7, %v726_v30 }
 0x33e   :  { %v1879_v1 = vpop.f32.mrf.mxu3 }
 0x346   :  { %v630_v3 = vpop.f32.mrf.mxu3 }
 0x347   :  { %v633_v5 = vsel %vm301_vm8, %v630_v3, -inf }
 0x348   :  { %634 = vmax.xlane.f32.xlu0 %v633_v5 }
 0x3a9   :  { %v475_v44 = vpop.f32.mrf.mxu2 }
 0x3aa   :  { %v499_v50 = vadd.f32 %v1879_v1, %v475_v44 }
 0x3b1   :  { %v600_v17 = vpop.f32.mrf.mxu2 }
 0x3b2   :  { %v603_v51 = vadd.f32 %v600_v17, %v499_v50 }
 0x3b7   :  { %v782_v31 = vpop.f32.mrf.mxu3 }
 0x3b8   :  { %v783_v22 = vadd.f32 %v1761_v52, %v782_v31 }
 0x3b9   :  { %v746_v2 = vpop.f32.mrf.mxu2 }
 0x3ba   :  { %897 = vrot.lane.b32.xlu2 %v783_v22, %s1607_s24  ;;  %v747_v4 = vadd.f32 %v1766_v55, %v746_v2  ;;  %1349 = vmatpush.xpose.msk.msra.mxu1 %vm301_vm8, %v783_v22 }
 0x3bb   :  { %v635_v12 = vpop.xlane.xlu0 %634 }
 0x3bc   :  { %v636_v7 = vsub.f32 %v630_v3, %v635_v12  ;;  %v789_v12 = vrot.slane %v1793_v21, 6 }
 0x3be   :  { %v637_v53 = vmul.f32 1.442695, %v636_v7  ;;  %v791_v7 = vrot.slane %v1804_v34, 5 }
 0x3c0   :  { %1397 = vpow2.f32 %v637_v53  ;;  %v793_v53 = vrot.slane %v1806_v35, 4 }
 0x3c2   :  { %1126 = vrot.lane.b32.xlu2 %v783_v22, %s1608_s25 }
 0x3c6   :  { %v1398_v13 = vpop.eup %1397 }
 0x3c7   :  { %v639_v56 = vsel %vm301_vm8, %v1398_v13, 0.0 }
 0x3c8   :  { %640 = vadd.xlane.f32.xlu0 %v639_v56 }
 0x3ca   :  { %1124 = vrot.lane.b32.xlu2 %v747_v4, %s1608_s25 }
 0x3d2   :  { %1023 = vrot.lane.b32.xlu2 %v783_v22, %s1606_s4 }
 0x414   :  { %v898_v18 = vpop.permute.xlu2 %897 }
 0x415   :  { %1352 = vmatpush.xpose.msk.msrb.mxu3 %vm301_vm8, %v898_v18 }
 0x41c   :  { %v1127_v55 = vpop.permute.xlu2 %1126 }
 0x424   :  { %v1933_v47 = vpop.permute.xlu2 %1124 }
 0x42c   :  { %v1024_v28 = vpop.permute.xlu2 %1023 }
 0x42d   :  { %1357 = vmatpush.xpose.msk.msra.mxu3 %vm301_vm8, %v1024_v28 }
 0x43b   :  { %v641_v33 = vpop.xlane.xlu0 %640 }
 0x43c   :  { %1399 = vrcp.f32 %v641_v33  ;;  %v653_v48 = vand.u32 2147483648, %v641_v33  ;;  %v651_v41 = vand.u32 2147483647, %v641_v33  ;;  %vm647_vm15 = vweird.f32 %v641_v33 }
 0x43e   :  { %v654_v43 = vor.u32 1.1754944e-38, %v653_v48  ;;  %vm652_vm10 = vcmp.eq.f32.partialorder %v651_v41, 8.507059e+37 }
 0x442   :  { %v1400_v37 = vpop.eup %1399 }
 0x443   :  { %v643_v45 = vmul.f32 %v1400_v37, %v641_v33  ;;  %vm648_vm14 = vweird.f32 %v1400_v37 }
 0x444   :  { %vm649_vm9 = vmor %vm647_vm15, %vm648_vm14 }
 0x445   :  { %v644_v46 = vsub.f32 1.0, %v643_v45 }
 0x447   :  { %v645_v60 = vmul.f32 %v1400_v37, %v644_v46 }
 0x449   :  { %v646_v49 = vadd.f32 %v1400_v37, %v645_v60 }
 0x44b   :  { %v650_v25 = vsel %vm649_vm9, %v1400_v37, %v646_v49 }
 0x44c   :  { %v655_v52 = vsel %vm652_vm10, %v654_v43, %v650_v25 }
 0x44d   :  { %v656_v0 = vmul.f32 %v1398_v13, %v655_v52  ;;  %v795_v13 = vrot.slane %v1808_v36, 3 }
 0x44f   :  { %1344 = vmatmul.msk.f32.vlgmr.msrb.gmra.mxu0 %vm301_vm8, %v656_v0  ;;  %v707_v3 = vadd.f32 %v656_v0, %v1854_v42 }
 0x451   :  { %v712_v5 = vmul.f32 0.25, %v707_v3 }
 0x453   :  { %1286 = vst.msk [vmem:[#allocation12] sm:$0xff] %vm301_vm8, %v712_v5 }
 0x4cc   :  { %v680_v42 = vpop.f32.mrf.mxu0 }
 0x4cd   :  { %1345 = vmatmul.msk.f32.vlgmr.msrb.gmra.mxu1 %vm301_vm8, %v680_v42 }
 0x4ce   :  { %992 = vmatpush.msrb.mxu1 %v1867_v19  ;;  %v785_v19 = vrot.slane %v1791_v20, 1 }
 0x4d0   :  { %v786_v1 = vsel %vm164_vm0, %v1784_v15, %v785_v19 }
 0x4d5   :  { %1350 = vmatmul.msk.f32.vlgmr.msra.gmra.mxu1 %vm301_vm8, %v747_v4 }
 0x4d6   :  { %1117 = vmatpush.msra.mxu1 %v1870_v24  ;;  %v787_v24 = vrot.slane %v1786_v16, 7 }
 0x4d8   :  { %v788_v56 = vsel %vm167_vm1, %v787_v24, %v786_v1 }
 0x4d9   :  { %v790_v32 = vsel %vm170_vm2, %v789_v12, %v788_v56 }
 0x4da   :  { %v792_v20 = vsel %vm173_vm3, %v791_v7, %v790_v32 }
 0x4db   :  { %v794_v16 = vsel %vm176_vm4, %v793_v53, %v792_v20 }
 0x4dc   :  { %v796_v21 = vsel %vm179_vm5, %v795_v13, %v794_v16 }
 0x4dd   :  { %v798_v34 = vsel %vm182_vm6, %v797_v14, %v796_v21 }
 0x4de   :  { %1348 = vmatmul.msk.f32.vlgmr.msra.gmra.mxu0 %vm184_vm7, %v798_v34 }
 0x54a   :  { %v703_v11 = vpop.f32.mrf.mxu1 }
 0x54b   :  { %v1937_v8 = vadd.f32 %v703_v11, %v603_v51 }
 0x552   :  { %v844_v9 = vpop.f32.mrf.mxu1 }
 0x553   :  { %v847_v10 = vsel %vm301_vm8, %v844_v9, -inf }
 0x554   :  { %848 = vmax.xlane.f32.xlu1 %v847_v10 }
 0x55b   :  { %v818_v39 = vpop.f32.mrf.mxu0 }
 0x55c   :  { %v1960_v59 = vadd.f32 %v1833_v63, %v818_v39 }
 0x55e   :  { %889 = vmatpush.msra.mxu2 %v1960_v59 }
 0x560   :  { %1015 = vmatpush.msrb.mxu2 %v1838_v38 }
 0x5c7   :  { %v849_v35 = vpop.xlane.xlu1 %848 }
 0x5c8   :  { %v850_v15 = vsub.f32 %v844_v9, %v849_v35 }
 0x5ca   :  { %v851_v57 = vmul.f32 1.442695, %v850_v15 }
 0x5cc   :  { %1401 = vpow2.f32 %v851_v57 }
 0x5d2   :  { %v1402_v36 = vpop.eup %1401 }
 0x5d3   :  { %v853_v58 = vsel %vm301_vm8, %v1402_v36, 0.0 }
 0x5d4   :  { %854 = vadd.xlane.f32.xlu0 %v853_v58 }
 0x5e8   :  { %895 = vrot.lane.b32.xlu0 %v747_v4, %s1607_s24 }
 0x5f0   :  { %1021 = vrot.lane.b32.xlu0 %v747_v4, %s1606_s4 }
 0x647   :  { %v855_v61 = vpop.xlane.xlu0 %854 }
 0x648   :  { %1403 = vrcp.f32 %v855_v61  ;;  %v867_v40 = vand.u32 2147483648, %v855_v61  ;;  %v865_v27 = vand.u32 2147483647, %v855_v61  ;;  %vm861_vm1 = vweird.f32 %v855_v61 }
 0x64a   :  { %v868_v30 = vor.u32 1.1754944e-38, %v867_v40  ;;  %vm866_vm3 = vcmp.eq.f32.partialorder %v865_v27, 8.507059e+37 }
 0x64e   :  { %v1404_v23 = vpop.eup %1403 }
 0x64f   :  { %v857_v62 = vmul.f32 %v1404_v23, %v855_v61  ;;  %vm862_vm0 = vweird.f32 %v1404_v23 }
 0x650   :  { %vm863_vm2 = vmor %vm861_vm1, %vm862_vm0  ;;  %vm1277_vm1 = vcmask 254976  }
 0x651   :  { %v858_v54 = vsub.f32 1.0, %v857_v62 }
 0x653   :  { %v859_v26 = vmul.f32 %v1404_v23, %v858_v54 }
 0x655   :  { %v860_v29 = vadd.f32 %v1404_v23, %v859_v26 }
 0x657   :  { %v864_v31 = vsel %vm863_vm2, %v1404_v23, %v860_v29 }
 0x658   :  { %v869_v63 = vsel %vm866_vm3, %v868_v30, %v864_v31 }
 0x659   :  { %v1964_v22 = vmul.f32 %v1402_v36, %v869_v63 }
 0x65a   :  { %v896_v33 = vpop.permute.xlu0 %895 }
 0x65b   :  { %1351 = vmatmul.msk.f32.vlgmr.msra.gmra.mxu2 %vm301_vm8, %v1964_v22  ;;  %1353 = vmatmul.msk.f32.vlgmr.msrb.gmra.mxu3 %vm301_vm8, %v896_v33 }
 0x65c   :  { %1361 = vmatpush.xpose.msk.msra.mxu2 %vm301_vm8, %v1127_v55 }
 0x662   :  { %v1022_v38 = vpop.permute.xlu0 %1021 }
 0x663   :  { %1358 = vmatmul.msk.f32.vlgmr.msra.gmra.mxu3 %vm301_vm8, %v1022_v38 }
 0x6de   :  { %v891_v37 = vpop.f32.mrf.mxu2  ;;  %v920_v45 = vpop.f32.mrf.mxu3 }
 0x6df   :  { %1356 = vmatmul.msk.f32.vlgmr.msrb.gmra.mxu2 %vm301_vm8, %v891_v37  ;;  %v923_v46 = vsel %vm301_vm8, %v920_v45, -inf }
 0x6e0   :  { %924 = vmax.xlane.f32.xlu2 %v923_v46 }
 0x6e6   :  { %v1046_v48 = vpop.f32.mrf.mxu3 }
 0x6e7   :  { %1362 = vmatmul.msk.f32.vlgmr.msra.gmra.mxu2 %vm301_vm8, %v1933_v47  ;;  %v1049_v60 = vsel %vm301_vm8, %v1046_v48, -inf }
 0x6e8   :  { %1050 = vmax.xlane.f32.xlu1 %v1049_v60 }
 0x6f8   :  { %1176 = vrot.lane.b32.xlu2 %v1960_v59, %s1608_s25 }
 0x753   :  { %v925_v41 = vpop.xlane.xlu2 %924 }
 0x754   :  { %v926_v49 = vsub.f32 %v920_v45, %v925_v41 }
 0x756   :  { %v927_v43 = vmul.f32 1.442695, %v926_v49 }
 0x758   :  { %1405 = vpow2.f32 %v927_v43  ;;  %v1384_v43 = vld [vmem:[#allocation10 + $0x3] ss:$0 sm:$0xff] }
 0x75b   :  { %v1177_v25 = vpop.permute.xlu2 %1176  ;;  %v1051_v52 = vpop.xlane.xlu1 %1050 }
 0x75c   :  { %v1052_v0 = vsub.f32 %v1046_v48, %v1051_v52  ;;  %1197 = vmatpush.msrb.mxu3 %v1177_v25 }
 0x75e   :  { %v1406_v3 = vpop.eup %1405  ;;  %v1053_v5 = vmul.f32 1.442695, %v1052_v0  ;;  %v711_v0 = vadd.f32 %v1384_v43, %v1937_v8 }
 0x75f   :  { %v929_v44 = vsel %vm301_vm8, %v1406_v3, 0.0 }
 0x760   :  { %1407 = vpow2.f32 %v1053_v5  ;;  %930 = vadd.xlane.f32.xlu1 %v929_v44 }
 0x762   :  { %v1979_v17 = vpop.f32.mrf.mxu2 }
 0x766   :  { %v1408_v2 = vpop.eup %1407 }
 0x767   :  { %v1055_v4 = vsel %vm301_vm8, %v1408_v2, 0.0 }
 0x768   :  { %1056 = vadd.xlane.f32.xlu1 %v1055_v4  ;;  %v1231_v4 = vrot.slane %v711_v0, 2 }
 0x76a   :  { %v1149_v18 = vpop.f32.mrf.mxu2 }
 0x76b   :  { %v1152_v42 = vsel %vm301_vm8, %v1149_v18, -inf }
 0x76c   :  { %1153 = vmax.xlane.f32.xlu0 %v1152_v42  ;;  %v1232_v42 = vrot.slane %v711_v0, 3 }
 0x780   :  { %1073 = vrot.lane.b32.xlu0 %v1960_v59, %s1606_s4 }
 0x7d3   :  { %v931_v11 = vpop.xlane.xlu1 %930 }
 0x7d4   :  { %v943_v32 = vand.u32 2147483648, %v931_v11  ;;  %vm937_vm5 = vweird.f32 %v931_v11  ;;  %v941_v20 = vand.u32 2147483647, %v931_v11 }
 0x7d6   :  { %v944_v57 = vor.u32 1.1754944e-38, %v943_v32  ;;  %vm942_vm13 = vcmp.eq.f32.partialorder %v941_v20, 8.507059e+37 }
 0x7db   :  { %v1057_v9 = vpop.xlane.xlu1 %1056 }
 0x7dc   :  { %v1069_v21 = vand.u32 2147483648, %v1057_v9  ;;  %vm1063_vm11 = vweird.f32 %v1057_v9  ;;  %v1067_v35 = vand.u32 2147483647, %v1057_v9 }
 0x7de   :  { %vm1068_vm14 = vcmp.eq.f32.partialorder %v1067_v35, 8.507059e+37 }
 0x7df   :  { %v1154_v55 = vpop.xlane.xlu0 %1153 }
 0x7e0   :  { %v1155_v47 = vsub.f32 %v1149_v18, %v1154_v55  ;;  %v1233_v55 = vrot.slane %v711_v0, 4 }
 0x7e2   :  { %v1156_v28 = vmul.f32 1.442695, %v1155_v47 }
 0x7e4   :  { %1409 = vpow2.f32 %v1156_v28 }
 0x7e5   :  { %1411 = vrcp.f32 %v931_v11 }
 0x7e6   :  { %1413 = vrcp.f32 %v1057_v9 }
 0x7ea   :  { %v1410_v50 = vpop.eup %1409 }
 0x7eb   :  { %v1158_v51 = vsel %vm301_vm8, %v1410_v50, 0.0  ;;  %v1412_v10 = vpop.eup %1411 }
 0x7ec   :  { %1159 = vadd.xlane.f32.xlu1 %v1158_v51  ;;  %v1414_v19 = vpop.eup %1413  ;;  %v933_v24 = vmul.f32 %v1412_v10, %v931_v11  ;;  %vm938_vm4 = vweird.f32 %v1412_v10 }
 0x7ed   :  { %v1059_v12 = vmul.f32 %v1414_v19, %v1057_v9  ;;  %vm1064_vm6 = vweird.f32 %v1414_v19  ;;  %vm939_vm7 = vmor %vm937_vm5, %vm938_vm4 }
 0x7ee   :  { %v934_v7 = vsub.f32 1.0, %v933_v24  ;;  %vm1065_vm12 = vmor %vm1063_vm11, %vm1064_vm6 }
 0x7ef   :  { %v1060_v53 = vsub.f32 1.0, %v1059_v12 }
 0x7f0   :  { %v935_v1 = vmul.f32 %v1412_v10, %v934_v7  ;;  %v1234_v7 = vrot.slane %v711_v0, 5 }
 0x7f1   :  { %v1061_v13 = vmul.f32 %v1414_v19, %v1060_v53 }
 0x7f2   :  { %v936_v14 = vadd.f32 %v1412_v10, %v935_v1  ;;  %v1074_v60 = vpop.permute.xlu0 %1073 }
 0x7f3   :  { %v1062_v16 = vadd.f32 %v1414_v19, %v1061_v13 }
 0x7f4   :  { %v940_v34 = vsel %vm939_vm7, %v1412_v10, %v936_v14 }
 0x7f5   :  { %v1066_v36 = vsel %vm1065_vm12, %v1414_v19, %v1062_v16  ;;  %v945_v39 = vsel %vm942_vm13, %v944_v57, %v940_v34  ;;  %v1235_v16 = vrot.slane %v711_v0, 6  ;;  %v1236_v34 = vrot.slane %v711_v0, 7 }
 0x7f6   :  { %v946_v26 = vmul.f32 %v1406_v3, %v945_v39 }
 0x7f8   :  { %v1020_v63 = vadd.f32 %v946_v26, %v1964_v22 }
 0x805   :  { %948 = vrot.lane.b32.xlu1 %v1960_v59, %s1607_s24  ;;  %v1070_v59 = vor.u32 1.1754944e-38, %v1069_v21 }
 0x807   :  { %v1071_v23 = vsel %vm1068_vm14, %v1070_v59, %v1066_v36 }
 0x808   :  { %v1072_v29 = vmul.f32 %v1408_v2, %v1071_v23  ;;  %v1230_v2 = vrot.slane %v711_v0, 1 }
 0x80a   :  { %v1123_v37 = vadd.f32 %v1072_v29, %v1020_v63 }
 0x85f   :  { %v1160_v56 = vpop.xlane.xlu1 %1159 }
 0x860   :  { %1415 = vrcp.f32 %v1160_v56  ;;  %v1172_v62 = vand.u32 2147483648, %v1160_v56  ;;  %v1170_v40 = vand.u32 2147483647, %v1160_v56  ;;  %vm1166_vm9 = vweird.f32 %v1160_v56 }
 0x862   :  { %v1173_v30 = vor.u32 1.1754944e-38, %v1172_v62  ;;  %vm1171_vm0 = vcmp.eq.f32.partialorder %v1170_v40, 8.507059e+37 }
 0x866   :  { %v1416_v15 = vpop.eup %1415 }
 0x867   :  { %v1162_v58 = vmul.f32 %v1416_v15, %v1160_v56  ;;  %vm1167_vm15 = vweird.f32 %v1416_v15 }
 0x868   :  { %vm1168_vm10 = vmor %vm1166_vm9, %vm1167_vm15 }
 0x869   :  { %v1163_v61 = vsub.f32 1.0, %v1162_v58 }
 0x86b   :  { %v1164_v54 = vmul.f32 %v1416_v15, %v1163_v61 }
 0x86d   :  { %v1165_v27 = vadd.f32 %v1416_v15, %v1164_v54 }
 0x86f   :  { %v1169_v31 = vsel %vm1168_vm10, %v1416_v15, %v1165_v27 }
 0x870   :  { %v1174_v33 = vsel %vm1171_vm0, %v1173_v30, %v1169_v31 }
 0x871   :  { %v1175_v38 = vmul.f32 %v1410_v50, %v1174_v33 }
 0x873   :  { %1363 = vmatmul.msk.f32.vlgmr.msrb.gmra.mxu3 %vm301_vm8, %v1175_v38  ;;  %v1226_v45 = vadd.f32 %v1175_v38, %v1123_v37 }
 0x875   :  { %v1228_v46 = vmul.f32 0.25, %v1226_v45 }
 0x877   :  { %v949_v48 = vpop.permute.xlu1 %948  ;;  %1287 = vst.msk [vmem:[#allocation12 + $0x8] sm:$0xff] %vm301_vm8, %v1228_v46 }
 0x878   :  { %969 = vmatpush.msrb.mxu0 %v949_v48  ;;  %1313 = dma.vmem_to_hbm [thread:$0]  %s1306_s27, 256, %s1308_s8, [#allocation13], %s1599_s9, %s1599_s9, %s1600_s1  }
 0x879   :  { %1354 = vmatmul.msk.f32.vlgmr.msrb.gmra.mxu0 %vm301_vm8, %v946_v26  ;;  %s1292_s9 = sshll.u32 %s1610_s6, 4  ;;  %s1293_s9 = int_to_ptr.vmem [resolvable:$true] %s1292_s9 }
 0x87a   :  { %1094 = vmatpush.msra.mxu0 %v1074_v60 }
 0x87c   :  { %1220 = vmatpush.msrb.mxu0 %v1923_v6 }
 0x881   :  { %1359 = vmatmul.msk.f32.vlgmr.msra.gmra.mxu0 %vm301_vm8, %v1072_v29 }
 0x8f6   :  { %v971_v22 = vpop.f32.mrf.mxu0  ;;  %v1199_v41 = vpop.f32.mrf.mxu3 }
 0x8f7   :  { %1355 = vmatmul.msk.f32.vlgmr.msrb.gmra.mxu1 %vm301_vm8, %v971_v22  ;;  %1364 = vmatmul.msk.f32.vlgmr.msrb.gmra.mxu0 %vm301_vm8, %v1199_v41 }
 0x8fe   :  { %v1096_v49 = vpop.f32.mrf.mxu0 }
 0x8ff   :  { %1360 = vmatmul.msk.f32.vlgmr.msra.gmra.mxu1 %vm301_vm8, %v1096_v49  ;;  %vm1268_vm8 = vcmask 1040384  }
 0x974   :  { %v994_v6 = vpop.f32.mrf.mxu1  ;;  %v1222_v5 = vpop.f32.mrf.mxu0 }
 0x975   :  { %v1018_v25 = vadd.f32 %v1979_v17, %v994_v6 }
 0x97c   :  { %v1119_v52 = vpop.f32.mrf.mxu1 }
 0x97d   :  { %v1122_v3 = vadd.f32 %v1119_v52, %v1018_v25 }
 0x97f   :  { %v1225_v44 = vadd.f32 %v1222_v5, %v1122_v3 }
 0x981   :  { %v1227_v18 = vadd.f32 %v1384_v43, %v1225_v44 }
 0x983   :  { %v1245_v47 = vrot.slane %v1227_v18, 1  ;;  %v1246_v28 = vrot.slane %v1227_v18, 2  ;;  %v1247_v50 = vrot.slane %v1227_v18, 3  ;;  %v1248_v51 = vrot.slane %v1227_v18, 4 }
 0x984   :  { %v1249_v11 = vrot.slane %v1227_v18, 5  ;;  %v1250_v9 = vrot.slane %v1227_v18, 6  ;;  %v1251_v17 = vrot.slane %v1227_v18, 7  ;;  %v1252_v10 = vperm.slane %v1227_v18, 0 }
 0x985   :  { %v1253_v19 = vperm.slane %v1245_v47, 0  ;;  %v1254_v8 = vperm.slane %v1246_v28, 0  ;;  %v1255_v24 = vperm.slane %v1247_v50, 0  ;;  %v1256_v12 = vperm.slane %v1248_v51, 0 }
 0x986   :  { %v1257_v53 = vperm.slane %v1249_v11, 0  ;;  %v1258_v1 = vperm.slane %v1250_v9, 0  ;;  %v1269_v13 = vsel %vm1268_vm8, %v711_v0, %v1252_v10  ;;  %v1259_v56 = vperm.slane %v1251_v17, 0 }
 0x987   :  { %v1270_v14 = vsel %vm1268_vm8, %v1230_v2, %v1253_v19  ;;  %v1271_v32 = vsel %vm1268_vm8, %v1231_v4, %v1254_v8  ;;  %v1272_v20 = vsel %vm1268_vm8, %v1232_v42, %v1255_v24  ;;  %1278 = vst.msk [vmem:[#allocation11] sm:$0x3] %vm1277_vm1, %v1269_v13  ;;  %v1273_v21 = vsel %vm1268_vm8, %v1233_v55, %v1256_v12 }
 0x988   :  { %1279 = vst.msk [vmem:[#allocation11 + $0x2] sm:$0x3] %vm1277_vm1, %v1270_v14  ;;  %v1274_v35 = vsel %vm1268_vm8, %v1234_v7, %v1257_v53  ;;  %v1275_v15 = vsel %vm1268_vm8, %v1235_v16, %v1258_v1  ;;  %v1276_v57 = vsel %vm1268_vm8, %v1236_v34, %v1259_v56 }
 0x989   :  { %1280 = vst.msk [vmem:[#allocation11 + $0x4] sm:$0x3] %vm1277_vm1, %v1271_v32 }
 0x98a   :  { %1281 = vst.msk [vmem:[#allocation11 + $0x6] sm:$0x3] %vm1277_vm1, %v1272_v20 }
 0x98b   :  { %1282 = vst.msk [vmem:[#allocation11 + $0x8] sm:$0x3] %vm1277_vm1, %v1273_v21 }
 0x98c   :  { %1283 = vst.msk [vmem:[#allocation11 + $0xa] sm:$0x3] %vm1277_vm1, %v1274_v35 }
 0x98d   :  { %1284 = vst.msk [vmem:[#allocation11 + $0xc] sm:$0x3] %vm1277_vm1, %v1275_v15 }
 0x98e   :  { %1285 = vst.msk [vmem:[#allocation11 + $0xe] sm:$0x3] %vm1277_vm1, %v1276_v57 }
 0x98f   :  { %1300 = dma.vmem_to_hbm [thread:$0]  %s1293_s9, 256, %s1295_s11, [#allocation4], %s1596_s29, %s1596_s29, %s1597_s30  }
 0x990   :  { %1591 = dma.done.wait [#allocation4], 256  }
 0x991   :  { %1592 = vsyncadd [#allocation4], 4294967040 }
 0x992   :  { %1593 = dma.done.wait [#allocation13], 256  }
 0x993   :  { %1594 = vsyncadd [#allocation13], 4294967040 }
 0x994   :  { %1322 = vsyncpa [#allocation3], 1 }
 0x995   :  { %1323 = vsyncpa [#allocation6], 1 }
 0x996   :  { %1324 = vsyncpa [#allocation9], 1 }
 0x997   :  { %1325 = vsyncpa [#allocation4], 1 }
 0x998   :  { %1326 = vsyncpa [#allocation13], 1 }

</bundles_post_ra>
